<compile_context>
chip_gen: v7x
topology: tpu7x:2x2x1
jax: 0.10.0
libtpu: 0.0.40
codegen_flags: <defaults>
</compile_context>

<pallas_src>
import functools
import math

import jax
import jax.numpy as jnp
import numpy as np
from jax.experimental import pallas as pl
from jax.experimental.pallas import tpu as pltpu

# x @ W.T for PyTorch-layout weights (out_features, in_features): contract the
# last dim of x with the last dim of W -> no transpose/relayout in the kernel.
_DN_XWT = (((1,), (1,)), ((), ()))


# ----------------------------------------------------------------------------
# Fused multi-head attention: one pallas_call per MHA block, grid over batch.
# ----------------------------------------------------------------------------
def fused_mha(x_q, x_kv, p, nhead):
    """nn.MultiheadAttention(batch_first=True) forward, need_weights=False."""
    B, Sq, D = x_q.shape
    Sk = x_kv.shape[1]
    dh = D // nhead
    scale = 1.0 / math.sqrt(dh)

    w_in, b_in = p["in_proj_w"], p["in_proj_b"]
    w_q = w_in[:D]                       # (D, D)
    w_kv = w_in[D:]                      # (2D, D)   k-rows then v-rows
    b_q = b_in[:D].reshape(1, D)
    b_kv = b_in[D:].reshape(1, 2 * D)
    w_o = p["out_w"]                     # (D, D)
    b_o = p["out_b"].reshape(1, D)

    def kernel(xq_ref, xkv_ref, wq_ref, bq_ref, wkv_ref, bkv_ref,
               wo_ref, bo_ref, o_ref):
        xq = xq_ref[...]                                     # (Sq, D)
        xkv = xkv_ref[...]                                   # (Sk, D)
        # One MXU pass for Q, one for packed [K|V].
        q = jax.lax.dot_general(xq, wq_ref[...], _DN_XWT,
                                preferred_element_type=jnp.float32) + bq_ref[...]
        kv = jax.lax.dot_general(xkv, wkv_ref[...], _DN_XWT,
                                 preferred_element_type=jnp.float32) + bkv_ref[...]
        k = kv[:, :D]                                        # (Sk, D)
        v = kv[:, D:]                                        # (Sk, D)
        wo = wo_ref[...]                                     # (D, D)

        # All heads handled in this single grid step; output projection is
        # accumulated per head (sum_h attn_h @ W_out[:, h].T == concat-then-proj),
        # which avoids any in-kernel concatenate/transpose.
        acc = jnp.zeros((Sq, D), jnp.float32)
        for h in range(nhead):
            sl = slice(h * dh, (h + 1) * dh)
            qh = q[:, sl] * scale                            # (Sq, dh)
            s = jax.lax.dot_general(qh, k[:, sl], _DN_XWT,
                                    preferred_element_type=jnp.float32)  # (Sq, Sk)
            s = s - jnp.max(s, axis=-1, keepdims=True)
            pe = jnp.exp(s)
            pe = pe * pl.reciprocal(jnp.sum(pe, axis=-1, keepdims=True),
                                    approx=True)
            oh = jnp.dot(pe, v[:, sl],
                         preferred_element_type=jnp.float32)             # (Sq, dh)
            acc = acc + jax.lax.dot_general(oh, wo[:, sl], _DN_XWT,
                                            preferred_element_type=jnp.float32)
        o_ref[...] = (acc + bo_ref[...]).astype(o_ref.dtype)

    return pl.pallas_call(
        kernel,
        out_shape=jax.ShapeDtypeStruct((B, Sq, D), x_q.dtype),
        grid=(B,),
        in_specs=[
            pl.BlockSpec((None, Sq, D), lambda b: (b, 0, 0)),
            pl.BlockSpec((None, Sk, D), lambda b: (b, 0, 0)),
            pl.BlockSpec((D, D), lambda b: (0, 0)),
            pl.BlockSpec((1, D), lambda b: (0, 0)),
            pl.BlockSpec((2 * D, D), lambda b: (0, 0)),
            pl.BlockSpec((1, 2 * D), lambda b: (0, 0)),
            pl.BlockSpec((D, D), lambda b: (0, 0)),
            pl.BlockSpec((1, D), lambda b: (0, 0)),
        ],
        out_specs=pl.BlockSpec((None, Sq, D), lambda b: (b, 0, 0)),
        compiler_params=pltpu.CompilerParams(dimension_semantics=("parallel",)),
    )(x_q, x_kv, w_q, b_q, w_kv, b_kv, w_o, b_o)


# ----------------------------------------------------------------------------
# Fused FeedForward: linear1 -> ReLU -> linear2 -> LayerNorm, one pallas_call.
# ----------------------------------------------------------------------------
def fused_ff(x, p, eps=1e-5):
    B, S, D = x.shape
    H = p["w1"].shape[0]
    b1 = p["b1"].reshape(1, H)
    b2 = p["b2"].reshape(1, D)
    g = p["ln_g"].reshape(1, D)
    beta = p["ln_b"].reshape(1, D)

    def kernel(x_ref, w1_ref, b1_ref, w2_ref, b2_ref, g_ref, be_ref, o_ref):
        xv = x_ref[...]                                      # (S, D)
        h = jax.lax.dot_general(xv, w1_ref[...], _DN_XWT,
                                preferred_element_type=jnp.float32) + b1_ref[...]
        h = jnp.maximum(h, 0.0)                              # (S, H) stays in VMEM
        y = jax.lax.dot_general(h, w2_ref[...], _DN_XWT,
                                preferred_element_type=jnp.float32) + b2_ref[...]
        mean = jnp.mean(y, axis=-1, keepdims=True)
        yc = y - mean
        var = jnp.mean(yc * yc, axis=-1, keepdims=True)      # biased, like nn.LayerNorm
        o_ref[...] = (yc * jax.lax.rsqrt(var + eps) * g_ref[...]
                      + be_ref[...]).astype(o_ref.dtype)

    return pl.pallas_call(
        kernel,
        out_shape=jax.ShapeDtypeStruct((B, S, D), x.dtype),
        grid=(B,),
        in_specs=[
            pl.BlockSpec((None, S, D), lambda b: (b, 0, 0)),
            pl.BlockSpec((H, D), lambda b: (0, 0)),
            pl.BlockSpec((1, H), lambda b: (0, 0)),
            pl.BlockSpec((D, H), lambda b: (0, 0)),
            pl.BlockSpec((1, D), lambda b: (0, 0)),
            pl.BlockSpec((1, D), lambda b: (0, 0)),
            pl.BlockSpec((1, D), lambda b: (0, 0)),
        ],
        out_specs=pl.BlockSpec((None, S, D), lambda b: (b, 0, 0)),
        compiler_params=pltpu.CompilerParams(dimension_semantics=("parallel",)),
    )(x, p["w1"], b1, p["w2"], b2, g, beta)


# ----------------------------------------------------------------------------
# Fused fc head: Linear -> LeakyReLU(0.01) -> Linear, one pallas_call.
# ----------------------------------------------------------------------------
def fused_fc(x, w1, b1, w2, b2):
    B, S, D = x.shape
    N = w2.shape[0]
    b1r = b1.reshape(1, D)
    b2r = b2.reshape(1, N)

    def kernel(x_ref, w1_ref, b1_ref, w2_ref, b2_ref, o_ref):
        xv = x_ref[...]
        h = jax.lax.dot_general(xv, w1_ref[...], _DN_XWT,
                                preferred_element_type=jnp.float32) + b1_ref[...]
        h = jnp.where(h > 0, h, 0.01 * h)
        y = jax.lax.dot_general(h, w2_ref[...], _DN_XWT,
                                preferred_element_type=jnp.float32) + b2_ref[...]
        o_ref[...] = y.astype(o_ref.dtype)

    return pl.pallas_call(
        kernel,
        out_shape=jax.ShapeDtypeStruct((B, S, N), x.dtype),
        grid=(B,),
        in_specs=[
            pl.BlockSpec((None, S, D), lambda b: (b, 0, 0)),
            pl.BlockSpec((D, D), lambda b: (0, 0)),
            pl.BlockSpec((1, D), lambda b: (0, 0)),
            pl.BlockSpec((N, D), lambda b: (0, 0)),
            pl.BlockSpec((1, N), lambda b: (0, 0)),
        ],
        out_specs=pl.BlockSpec((None, S, N), lambda b: (b, 0, 0)),
        compiler_params=pltpu.CompilerParams(dimension_semantics=("parallel",)),
    )(x, w1, b1r, w2, b2r)


# ----------------------------------------------------------------------------
# Full forward (Pallas)
# ----------------------------------------------------------------------------
@functools.partial(jax.jit, static_argnums=(3,))
def decoder_forward_pallas(params, x, x1, nhead):
    for lp in params["layers"]:
        x = fused_mha(x, x, lp["attn1"], nhead)    # self-attention
        x = fused_mha(x, x1, lp["attn2"], nhead)   # cross-attention
        x = fused_ff(x, lp["ff"])                  # FeedForward (+LayerNorm)
    return fused_fc(x, params["fc1_w"], params["fc1_b"],
                    params["fc2_w"], params["fc2_b"])


# ----------------------------------------------------------------------------
# Pure-JAX reference (for correctness check)
# ----------------------------------------------------------------------------
def mha_ref(x_q, x_kv, p, nhead):
    B, Sq, D = x_q.shape
    Sk = x_kv.shape[1]
    dh = D // nhead
    w, b = p["in_proj_w"], p["in_proj_b"]
    q = x_q @ w[:D].T + b[:D]
    k = x_kv @ w[D:2 * D].T + b[D:2 * D]
    v = x_kv @ w[2 * D:].T + b[2 * D:]
    q = q.reshape(B, Sq, nhead, dh).transpose(0, 2, 1, 3)
    k = k.reshape(B, Sk, nhead, dh).transpose(0, 2, 1, 3)
    v = v.reshape(B, Sk, nhead, dh).transpose(0, 2, 1, 3)
    s = jnp.einsum("bhqd,bhkd->bhqk", q, k) / math.sqrt(dh)
    a = jax.nn.softmax(s, axis=-1)
    o = jnp.einsum("bhqk,bhkd->bhqd", a, v)
    o = o.transpose(0, 2, 1, 3).reshape(B, Sq, D)
    return o @ p["out_w"].T + p["out_b"]


def ff_ref(x, p, eps=1e-5):
    h = jnp.maximum(x @ p["w1"].T + p["b1"], 0.0)
    y = h @ p["w2"].T + p["b2"]
    mean = jnp.mean(y, -1, keepdims=True)
    var = jnp.mean((y - mean) ** 2, -1, keepdims=True)
    return (y - mean) * jax.lax.rsqrt(var + eps) * p["ln_g"] + p["ln_b"]


def decoder_forward_ref(params, x, x1, nhead):
    for lp in params["layers"]:
        x = mha_ref(x, x, lp["attn1"], nhead)
        x = mha_ref(x, x1, lp["attn2"], nhead)
        x = ff_ref(x, lp["ff"])
    h = x @ params["fc1_w"].T + params["fc1_b"]
    h = jnp.where(h > 0, h, 0.01 * h)
    return h @ params["fc2_w"].T + params["fc2_b"]


# ----------------------------------------------------------------------------
# Deterministic parameter initialization
# ----------------------------------------------------------------------------
def init_params(key, d_model, out_feat, nhead, n_layers, n_hidden=512):
    keys = iter(jax.random.split(key, 256))

    def w(shape, scale=0.05):
        return jax.random.normal(next(keys), shape, jnp.float32) * scale

    def mha_params():
        return {
            "in_proj_w": w((3 * d_model, d_model)),
            "in_proj_b": w((3 * d_model,), 0.01),
            "out_w": w((d_model, d_model)),
            "out_b": w((d_model,), 0.01),
        }

    layers = []
    for _ in range(n_layers):
        layers.append({
            "attn1": mha_params(),
            "attn2": mha_params(),
            "ff": {
                "w1": w((n_hidden, d_model)), "b1": w((n_hidden,), 0.01),
                "w2": w((d_model, n_hidden)), "b2": w((d_model,), 0.01),
                "ln_g": jnp.ones((d_model,), jnp.float32),
                "ln_b": jnp.zeros((d_model,), jnp.float32),
            },
        })
    return {
        "layers": layers,
        "fc1_w": w((d_model, d_model)), "fc1_b": w((d_model,), 0.01),
        "fc2_w": w((out_feat, d_model)), "fc2_b": w((out_feat,), 0.01),
    }


# ----------------------------------------------------------------------------
if __name__ == "__main__":
    d_model, out_feat, nhead, n_layers = 32, 16, 4, 2
    B, S_tgt, S_mem = 2, 8, 12

    key = jax.random.PRNGKey(0)
    kx, kx1, kp = jax.random.split(key, 3)
    x = jax.random.normal(kx, (B, S_tgt, d_model), jnp.float32)
    x1 = jax.random.normal(kx1, (B, S_mem, d_model), jnp.float32)
    params = init_params(kp, d_model, out_feat, nhead, n_layers)

    # Pallas-kernel forward
    out = decoder_forward_pallas(params, x, x1, nhead)
    out = jax.block_until_ready(out)

    # Pure-JAX reference for a sanity check
    ref = decoder_forward_ref(params, x, x1, nhead)
    ref = jax.block_until_ready(ref)

    assert out.shape == (B, S_tgt, out_feat), out.shape
    assert np.allclose(np.asarray(out), np.asarray(ref), atol=5e-2, rtol=5e-2)
    print("KERNEL_OK")
</pallas_src>

<mosaic_0001>
module attributes {stable_mosaic.version = 11 : i64} {
  func.func @kernel(%arg0: i32, %arg1: memref<1x8x32xf32, #tpu.memory_space<vmem>>, %arg2: memref<1x8x32xf32, #tpu.memory_space<vmem>>, %arg3: memref<32x32xf32, #tpu.memory_space<vmem>>, %arg4: memref<1x32xf32, #tpu.memory_space<vmem>>, %arg5: memref<64x32xf32, #tpu.memory_space<vmem>>, %arg6: memref<1x64xf32, #tpu.memory_space<vmem>>, %arg7: memref<32x32xf32, #tpu.memory_space<vmem>>, %arg8: memref<1x32xf32, #tpu.memory_space<vmem>>, %arg9: memref<1x8x32xf32, #tpu.memory_space<vmem>>) attributes {dimension_semantics = [#tpu.dimension_semantics<parallel>], iteration_bounds = array<i64: 2>, scalar_prefetch = 0 : i64, scratch_operands = 0 : i64, tpu.core_type = #tpu.core_type<tc>, window_params = [{transform_indices = @transform_0, window_bounds = array<i64: 1, 8, 32>}, {transform_indices = @transform_1, window_bounds = array<i64: 1, 8, 32>}, {pipeline_mode = #tpu.pipeline_mode<synchronous>, transform_indices = @transform_2, window_bounds = array<i64: 32, 32>}, {pipeline_mode = #tpu.pipeline_mode<synchronous>, transform_indices = @transform_3, window_bounds = array<i64: 1, 32>}, {pipeline_mode = #tpu.pipeline_mode<synchronous>, transform_indices = @transform_4, window_bounds = array<i64: 64, 32>}, {pipeline_mode = #tpu.pipeline_mode<synchronous>, transform_indices = @transform_5, window_bounds = array<i64: 1, 64>}, {pipeline_mode = #tpu.pipeline_mode<synchronous>, transform_indices = @transform_6, window_bounds = array<i64: 32, 32>}, {pipeline_mode = #tpu.pipeline_mode<synchronous>, transform_indices = @transform_7, window_bounds = array<i64: 1, 32>}, {transform_indices = @transform_8, window_bounds = array<i64: 1, 8, 32>}]} {
    %c0 = arith.constant 0 : index
    %c0_0 = arith.constant 0 : index
    %c0_1 = arith.constant 0 : index
    %0 = vector.load %arg1[%c0, %c0_0, %c0_1] : memref<1x8x32xf32, #tpu.memory_space<vmem>>, vector<1x8x32xf32>
    %1 = vector.shape_cast %0 : vector<1x8x32xf32> to vector<8x32xf32>
    %c0_2 = arith.constant 0 : index
    %c0_3 = arith.constant 0 : index
    %c0_4 = arith.constant 0 : index
    %2 = vector.load %arg2[%c0_2, %c0_3, %c0_4] : memref<1x8x32xf32, #tpu.memory_space<vmem>>, vector<1x8x32xf32>
    %3 = vector.shape_cast %2 : vector<1x8x32xf32> to vector<8x32xf32>
    %c0_5 = arith.constant 0 : index
    %c0_6 = arith.constant 0 : index
    %4 = vector.load %arg3[%c0_5, %c0_6] : memref<32x32xf32, #tpu.memory_space<vmem>>, vector<32x32xf32>
    %cst = arith.constant dense<0.000000e+00> : vector<8x32xf32>
    %5 = tpu.matmul %1, %4, %cst {dimension_numbers = #tpu.dot_dimension_numbers<[1], [1], [0], [0], [0, 0, 1, 0], [], []>} : vector<8x32xf32>, vector<32x32xf32>, vector<8x32xf32> -> vector<8x32xf32>
    %c0_7 = arith.constant 0 : index
    %c0_8 = arith.constant 0 : index
    %6 = vector.load %arg4[%c0_7, %c0_8] : memref<1x32xf32, #tpu.memory_space<vmem>>, vector<1x32xf32>
    %7 = vector.broadcast %6 : vector<1x32xf32> to vector<8x32xf32>
    %8 = arith.addf %5, %7 : vector<8x32xf32>
    %c0_9 = arith.constant 0 : index
    %c0_10 = arith.constant 0 : index
    %9 = vector.load %arg5[%c0_9, %c0_10] : memref<64x32xf32, #tpu.memory_space<vmem>>, vector<64x32xf32>
    %cst_11 = arith.constant dense<0.000000e+00> : vector<8x64xf32>
    %10 = tpu.matmul %3, %9, %cst_11 {dimension_numbers = #tpu.dot_dimension_numbers<[1], [1], [0], [0], [0, 0, 1, 0], [], []>} : vector<8x32xf32>, vector<64x32xf32>, vector<8x64xf32> -> vector<8x64xf32>
    %c0_12 = arith.constant 0 : index
    %c0_13 = arith.constant 0 : index
    %11 = vector.load %arg6[%c0_12, %c0_13] : memref<1x64xf32, #tpu.memory_space<vmem>>, vector<1x64xf32>
    %12 = vector.broadcast %11 : vector<1x64xf32> to vector<8x64xf32>
    %13 = arith.addf %10, %12 : vector<8x64xf32>
    %14 = vector.extract_strided_slice %13 {offsets = [0, 0], sizes = [8, 32], strides = [1, 1]} : vector<8x64xf32> to vector<8x32xf32>
    %15 = vector.extract_strided_slice %13 {offsets = [0, 32], sizes = [8, 32], strides = [1, 1]} : vector<8x64xf32> to vector<8x32xf32>
    %c0_14 = arith.constant 0 : index
    %c0_15 = arith.constant 0 : index
    %16 = vector.load %arg7[%c0_14, %c0_15] : memref<32x32xf32, #tpu.memory_space<vmem>>, vector<32x32xf32>
    %cst_16 = arith.constant 0.000000e+00 : f32
    %17 = vector.broadcast %cst_16 : f32 to vector<8x32xf32>
    %18 = vector.extract_strided_slice %8 {offsets = [0, 0], sizes = [8, 8], strides = [1, 1]} : vector<8x32xf32> to vector<8x8xf32>
    %cst_17 = arith.constant 0.353553385 : f32
    %19 = vector.broadcast %cst_17 : f32 to vector<8x8xf32>
    %20 = arith.mulf %18, %19 : vector<8x8xf32>
    %21 = vector.extract_strided_slice %14 {offsets = [0, 0], sizes = [8, 8], strides = [1, 1]} : vector<8x32xf32> to vector<8x8xf32>
    %cst_18 = arith.constant dense<0.000000e+00> : vector<8x8xf32>
    %22 = tpu.matmul %20, %21, %cst_18 {dimension_numbers = #tpu.dot_dimension_numbers<[1], [1], [0], [0], [0, 0, 1, 0], [], []>} : vector<8x8xf32>, vector<8x8xf32>, vector<8x8xf32> -> vector<8x8xf32>
    %cst_19 = arith.constant dense<0xFF800000> : vector<8xf32>
    %23 = vector.multi_reduction <maximumf>, %22, %cst_19 [1] : vector<8x8xf32> to vector<8xf32>
    %24 = vector.shape_cast %23 : vector<8xf32> to vector<8x1xf32>
    %25 = vector.broadcast %24 : vector<8x1xf32> to vector<8x8xf32>
    %26 = arith.subf %22, %25 : vector<8x8xf32>
    %27 = math.exp %26 : vector<8x8xf32>
    %cst_20 = arith.constant dense<0.000000e+00> : vector<8xf32>
    %28 = vector.multi_reduction <add>, %27, %cst_20 [1] : vector<8x8xf32> to vector<8xf32>
    %29 = vector.shape_cast %28 : vector<8xf32> to vector<8x1xf32>
    %30 = tpu.reciprocal %29 {approx = true} : vector<8x1xf32> -> vector<8x1xf32>
    %31 = vector.broadcast %30 : vector<8x1xf32> to vector<8x8xf32>
    %32 = arith.mulf %27, %31 : vector<8x8xf32>
    %33 = vector.extract_strided_slice %15 {offsets = [0, 0], sizes = [8, 8], strides = [1, 1]} : vector<8x32xf32> to vector<8x8xf32>
    %cst_21 = arith.constant dense<0.000000e+00> : vector<8x8xf32>
    %34 = tpu.matmul %32, %33, %cst_21 {dimension_numbers = #tpu.dot_dimension_numbers<[1], [0], [0], [1], [0, 0, 1, 1], [], []>} : vector<8x8xf32>, vector<8x8xf32>, vector<8x8xf32> -> vector<8x8xf32>
    %35 = vector.extract_strided_slice %16 {offsets = [0, 0], sizes = [32, 8], strides = [1, 1]} : vector<32x32xf32> to vector<32x8xf32>
    %cst_22 = arith.constant dense<0.000000e+00> : vector<8x32xf32>
    %36 = tpu.matmul %34, %35, %cst_22 {dimension_numbers = #tpu.dot_dimension_numbers<[1], [1], [0], [0], [0, 0, 1, 0], [], []>} : vector<8x8xf32>, vector<32x8xf32>, vector<8x32xf32> -> vector<8x32xf32>
    %37 = arith.addf %17, %36 : vector<8x32xf32>
    %38 = vector.extract_strided_slice %8 {offsets = [0, 8], sizes = [8, 8], strides = [1, 1]} : vector<8x32xf32> to vector<8x8xf32>
    %cst_23 = arith.constant 0.353553385 : f32
    %39 = vector.broadcast %cst_23 : f32 to vector<8x8xf32>
    %40 = arith.mulf %38, %39 : vector<8x8xf32>
    %41 = vector.extract_strided_slice %14 {offsets = [0, 8], sizes = [8, 8], strides = [1, 1]} : vector<8x32xf32> to vector<8x8xf32>
    %cst_24 = arith.constant dense<0.000000e+00> : vector<8x8xf32>
    %42 = tpu.matmul %40, %41, %cst_24 {dimension_numbers = #tpu.dot_dimension_numbers<[1], [1], [0], [0], [0, 0, 1, 0], [], []>} : vector<8x8xf32>, vector<8x8xf32>, vector<8x8xf32> -> vector<8x8xf32>
    %cst_25 = arith.constant dense<0xFF800000> : vector<8xf32>
    %43 = vector.multi_reduction <maximumf>, %42, %cst_25 [1] : vector<8x8xf32> to vector<8xf32>
    %44 = vector.shape_cast %43 : vector<8xf32> to vector<8x1xf32>
    %45 = vector.broadcast %44 : vector<8x1xf32> to vector<8x8xf32>
    %46 = arith.subf %42, %45 : vector<8x8xf32>
    %47 = math.exp %46 : vector<8x8xf32>
    %cst_26 = arith.constant dense<0.000000e+00> : vector<8xf32>
    %48 = vector.multi_reduction <add>, %47, %cst_26 [1] : vector<8x8xf32> to vector<8xf32>
    %49 = vector.shape_cast %48 : vector<8xf32> to vector<8x1xf32>
    %50 = tpu.reciprocal %49 {approx = true} : vector<8x1xf32> -> vector<8x1xf32>
    %51 = vector.broadcast %50 : vector<8x1xf32> to vector<8x8xf32>
    %52 = arith.mulf %47, %51 : vector<8x8xf32>
    %53 = vector.extract_strided_slice %15 {offsets = [0, 8], sizes = [8, 8], strides = [1, 1]} : vector<8x32xf32> to vector<8x8xf32>
    %cst_27 = arith.constant dense<0.000000e+00> : vector<8x8xf32>
    %54 = tpu.matmul %52, %53, %cst_27 {dimension_numbers = #tpu.dot_dimension_numbers<[1], [0], [0], [1], [0, 0, 1, 1], [], []>} : vector<8x8xf32>, vector<8x8xf32>, vector<8x8xf32> -> vector<8x8xf32>
    %55 = vector.extract_strided_slice %16 {offsets = [0, 8], sizes = [32, 8], strides = [1, 1]} : vector<32x32xf32> to vector<32x8xf32>
    %cst_28 = arith.constant dense<0.000000e+00> : vector<8x32xf32>
    %56 = tpu.matmul %54, %55, %cst_28 {dimension_numbers = #tpu.dot_dimension_numbers<[1], [1], [0], [0], [0, 0, 1, 0], [], []>} : vector<8x8xf32>, vector<32x8xf32>, vector<8x32xf32> -> vector<8x32xf32>
    %57 = arith.addf %37, %56 : vector<8x32xf32>
    %58 = vector.extract_strided_slice %8 {offsets = [0, 16], sizes = [8, 8], strides = [1, 1]} : vector<8x32xf32> to vector<8x8xf32>
    %cst_29 = arith.constant 0.353553385 : f32
    %59 = vector.broadcast %cst_29 : f32 to vector<8x8xf32>
    %60 = arith.mulf %58, %59 : vector<8x8xf32>
    %61 = vector.extract_strided_slice %14 {offsets = [0, 16], sizes = [8, 8], strides = [1, 1]} : vector<8x32xf32> to vector<8x8xf32>
    %cst_30 = arith.constant dense<0.000000e+00> : vector<8x8xf32>
    %62 = tpu.matmul %60, %61, %cst_30 {dimension_numbers = #tpu.dot_dimension_numbers<[1], [1], [0], [0], [0, 0, 1, 0], [], []>} : vector<8x8xf32>, vector<8x8xf32>, vector<8x8xf32> -> vector<8x8xf32>
    %cst_31 = arith.constant dense<0xFF800000> : vector<8xf32>
    %63 = vector.multi_reduction <maximumf>, %62, %cst_31 [1] : vector<8x8xf32> to vector<8xf32>
    %64 = vector.shape_cast %63 : vector<8xf32> to vector<8x1xf32>
    %65 = vector.broadcast %64 : vector<8x1xf32> to vector<8x8xf32>
    %66 = arith.subf %62, %65 : vector<8x8xf32>
    %67 = math.exp %66 : vector<8x8xf32>
    %cst_32 = arith.constant dense<0.000000e+00> : vector<8xf32>
    %68 = vector.multi_reduction <add>, %67, %cst_32 [1] : vector<8x8xf32> to vector<8xf32>
    %69 = vector.shape_cast %68 : vector<8xf32> to vector<8x1xf32>
    %70 = tpu.reciprocal %69 {approx = true} : vector<8x1xf32> -> vector<8x1xf32>
    %71 = vector.broadcast %70 : vector<8x1xf32> to vector<8x8xf32>
    %72 = arith.mulf %67, %71 : vector<8x8xf32>
    %73 = vector.extract_strided_slice %15 {offsets = [0, 16], sizes = [8, 8], strides = [1, 1]} : vector<8x32xf32> to vector<8x8xf32>
    %cst_33 = arith.constant dense<0.000000e+00> : vector<8x8xf32>
    %74 = tpu.matmul %72, %73, %cst_33 {dimension_numbers = #tpu.dot_dimension_numbers<[1], [0], [0], [1], [0, 0, 1, 1], [], []>} : vector<8x8xf32>, vector<8x8xf32>, vector<8x8xf32> -> vector<8x8xf32>
    %75 = vector.extract_strided_slice %16 {offsets = [0, 16], sizes = [32, 8], strides = [1, 1]} : vector<32x32xf32> to vector<32x8xf32>
    %cst_34 = arith.constant dense<0.000000e+00> : vector<8x32xf32>
    %76 = tpu.matmul %74, %75, %cst_34 {dimension_numbers = #tpu.dot_dimension_numbers<[1], [1], [0], [0], [0, 0, 1, 0], [], []>} : vector<8x8xf32>, vector<32x8xf32>, vector<8x32xf32> -> vector<8x32xf32>
    %77 = arith.addf %57, %76 : vector<8x32xf32>
    %78 = vector.extract_strided_slice %8 {offsets = [0, 24], sizes = [8, 8], strides = [1, 1]} : vector<8x32xf32> to vector<8x8xf32>
    %cst_35 = arith.constant 0.353553385 : f32
    %79 = vector.broadcast %cst_35 : f32 to vector<8x8xf32>
    %80 = arith.mulf %78, %79 : vector<8x8xf32>
    %81 = vector.extract_strided_slice %14 {offsets = [0, 24], sizes = [8, 8], strides = [1, 1]} : vector<8x32xf32> to vector<8x8xf32>
    %cst_36 = arith.constant dense<0.000000e+00> : vector<8x8xf32>
    %82 = tpu.matmul %80, %81, %cst_36 {dimension_numbers = #tpu.dot_dimension_numbers<[1], [1], [0], [0], [0, 0, 1, 0], [], []>} : vector<8x8xf32>, vector<8x8xf32>, vector<8x8xf32> -> vector<8x8xf32>
    %cst_37 = arith.constant dense<0xFF800000> : vector<8xf32>
    %83 = vector.multi_reduction <maximumf>, %82, %cst_37 [1] : vector<8x8xf32> to vector<8xf32>
    %84 = vector.shape_cast %83 : vector<8xf32> to vector<8x1xf32>
    %85 = vector.broadcast %84 : vector<8x1xf32> to vector<8x8xf32>
    %86 = arith.subf %82, %85 : vector<8x8xf32>
    %87 = math.exp %86 : vector<8x8xf32>
    %cst_38 = arith.constant dense<0.000000e+00> : vector<8xf32>
    %88 = vector.multi_reduction <add>, %87, %cst_38 [1] : vector<8x8xf32> to vector<8xf32>
    %89 = vector.shape_cast %88 : vector<8xf32> to vector<8x1xf32>
    %90 = tpu.reciprocal %89 {approx = true} : vector<8x1xf32> -> vector<8x1xf32>
    %91 = vector.broadcast %90 : vector<8x1xf32> to vector<8x8xf32>
    %92 = arith.mulf %87, %91 : vector<8x8xf32>
    %93 = vector.extract_strided_slice %15 {offsets = [0, 24], sizes = [8, 8], strides = [1, 1]} : vector<8x32xf32> to vector<8x8xf32>
    %cst_39 = arith.constant dense<0.000000e+00> : vector<8x8xf32>
    %94 = tpu.matmul %92, %93, %cst_39 {dimension_numbers = #tpu.dot_dimension_numbers<[1], [0], [0], [1], [0, 0, 1, 1], [], []>} : vector<8x8xf32>, vector<8x8xf32>, vector<8x8xf32> -> vector<8x8xf32>
    %95 = vector.extract_strided_slice %16 {offsets = [0, 24], sizes = [32, 8], strides = [1, 1]} : vector<32x32xf32> to vector<32x8xf32>
    %cst_40 = arith.constant dense<0.000000e+00> : vector<8x32xf32>
    %96 = tpu.matmul %94, %95, %cst_40 {dimension_numbers = #tpu.dot_dimension_numbers<[1], [1], [0], [0], [0, 0, 1, 0], [], []>} : vector<8x8xf32>, vector<32x8xf32>, vector<8x32xf32> -> vector<8x32xf32>
    %97 = arith.addf %77, %96 : vector<8x32xf32>
    %c0_41 = arith.constant 0 : index
    %c0_42 = arith.constant 0 : index
    %98 = vector.load %arg8[%c0_41, %c0_42] : memref<1x32xf32, #tpu.memory_space<vmem>>, vector<1x32xf32>
    %99 = vector.broadcast %98 : vector<1x32xf32> to vector<8x32xf32>
    %100 = arith.addf %97, %99 : vector<8x32xf32>
    %c0_43 = arith.constant 0 : index
    %c0_44 = arith.constant 0 : index
    %c0_45 = arith.constant 0 : index
    %101 = vector.load %arg9[%c0_43, %c0_44, %c0_45] : memref<1x8x32xf32, #tpu.memory_space<vmem>>, vector<1x8x32xf32>
    %102 = vector.shape_cast %101 : vector<1x8x32xf32> to vector<8x32xf32>
    %103 = vector.shape_cast %100 : vector<8x32xf32> to vector<1x8x32xf32>
    tpu.vector_store %arg9[%c0_43, %c0_44, %c0_45], %103 {strides = array<i32>} : memref<1x8x32xf32, #tpu.memory_space<vmem>>, vector<1x8x32xf32>,
    return
  }
  func.func @transform_0(%arg0: i32) -> (i32, i32, i32) {
    %c0_i32 = arith.constant 0 : i32
    %c0_i32_0 = arith.constant 0 : i32
    %c0_i32_1 = arith.constant 0 : i32
    return %arg0, %c0_i32, %c0_i32_0 : i32, i32, i32
  }
  func.func @transform_1(%arg0: i32) -> (i32, i32, i32) {
    %c0_i32 = arith.constant 0 : i32
    %c0_i32_0 = arith.constant 0 : i32
    %c0_i32_1 = arith.constant 0 : i32
    return %arg0, %c0_i32, %c0_i32_0 : i32, i32, i32
  }
  func.func @transform_2(%arg0: i32) -> (i32, i32) {
    %c0_i32 = arith.constant 0 : i32
    %c0_i32_0 = arith.constant 0 : i32
    %c0_i32_1 = arith.constant 0 : i32
    return %c0_i32, %c0_i32_0 : i32, i32
  }
  func.func @transform_3(%arg0: i32) -> (i32, i32) {
    %c0_i32 = arith.constant 0 : i32
    %c0_i32_0 = arith.constant 0 : i32
    %c0_i32_1 = arith.constant 0 : i32
    return %c0_i32, %c0_i32_0 : i32, i32
  }
  func.func @transform_4(%arg0: i32) -> (i32, i32) {
    %c0_i32 = arith.constant 0 : i32
    %c0_i32_0 = arith.constant 0 : i32
    %c0_i32_1 = arith.constant 0 : i32
    return %c0_i32, %c0_i32_0 : i32, i32
  }
  func.func @transform_5(%arg0: i32) -> (i32, i32) {
    %c0_i32 = arith.constant 0 : i32
    %c0_i32_0 = arith.constant 0 : i32
    %c0_i32_1 = arith.constant 0 : i32
    return %c0_i32, %c0_i32_0 : i32, i32
  }
  func.func @transform_6(%arg0: i32) -> (i32, i32) {
    %c0_i32 = arith.constant 0 : i32
    %c0_i32_0 = arith.constant 0 : i32
    %c0_i32_1 = arith.constant 0 : i32
    return %c0_i32, %c0_i32_0 : i32, i32
  }
  func.func @transform_7(%arg0: i32) -> (i32, i32) {
    %c0_i32 = arith.constant 0 : i32
    %c0_i32_0 = arith.constant 0 : i32
    %c0_i32_1 = arith.constant 0 : i32
    return %c0_i32, %c0_i32_0 : i32, i32
  }
  func.func @transform_8(%arg0: i32) -> (i32, i32, i32) {
    %c0_i32 = arith.constant 0 : i32
    %c0_i32_0 = arith.constant 0 : i32
    %c0_i32_1 = arith.constant 0 : i32
    return %arg0, %c0_i32, %c0_i32_0 : i32, i32, i32
  }
}

module attributes {stable_mosaic.version = 11 : i64} {
  func.func @kernel(%arg0: i32, %arg1: memref<1x8x32xf32, #tpu.memory_space<vmem>>, %arg2: memref<512x32xf32, #tpu.memory_space<vmem>>, %arg3: memref<1x512xf32, #tpu.memory_space<vmem>>, %arg4: memref<32x512xf32, #tpu.memory_space<vmem>>, %arg5: memref<1x32xf32, #tpu.memory_space<vmem>>, %arg6: memref<1x32xf32, #tpu.memory_space<vmem>>, %arg7: memref<1x32xf32, #tpu.memory_space<vmem>>, %arg8: memref<1x8x32xf32, #tpu.memory_space<vmem>>) attributes {dimension_semantics = [#tpu.dimension_semantics<parallel>], iteration_bounds = array<i64: 2>, scalar_prefetch = 0 : i64, scratch_operands = 0 : i64, tpu.core_type = #tpu.core_type<tc>, window_params = [{transform_indices = @transform_0, window_bounds = array<i64: 1, 8, 32>}, {pipeline_mode = #tpu.pipeline_mode<synchronous>, transform_indices = @transform_1, window_bounds = array<i64: 512, 32>}, {pipeline_mode = #tpu.pipeline_mode<synchronous>, transform_indices = @transform_2, window_bounds = array<i64: 1, 512>}, {pipeline_mode = #tpu.pipeline_mode<synchronous>, transform_indices = @transform_3, window_bounds = array<i64: 32, 512>}, {pipeline_mode = #tpu.pipeline_mode<synchronous>, transform_indices = @transform_4, window_bounds = array<i64: 1, 32>}, {pipeline_mode = #tpu.pipeline_mode<synchronous>, transform_indices = @transform_5, window_bounds = array<i64: 1, 32>}, {pipeline_mode = #tpu.pipeline_mode<synchronous>, transform_indices = @transform_6, window_bounds = array<i64: 1, 32>}, {transform_indices = @transform_7, window_bounds = array<i64: 1, 8, 32>}]} {
    %c0 = arith.constant 0 : index
    %c0_0 = arith.constant 0 : index
    %c0_1 = arith.constant 0 : index
    %0 = vector.load %arg1[%c0, %c0_0, %c0_1] : memref<1x8x32xf32, #tpu.memory_space<vmem>>, vector<1x8x32xf32>
    %1 = vector.shape_cast %0 : vector<1x8x32xf32> to vector<8x32xf32>
    %c0_2 = arith.constant 0 : index
    %c0_3 = arith.constant 0 : index
    %2 = vector.load %arg2[%c0_2, %c0_3] : memref<512x32xf32, #tpu.memory_space<vmem>>, vector<512x32xf32>
    %cst = arith.constant dense<0.000000e+00> : vector<8x512xf32>
    %3 = tpu.matmul %1, %2, %cst {dimension_numbers = #tpu.dot_dimension_numbers<[1], [1], [0], [0], [0, 0, 1, 0], [], []>} : vector<8x32xf32>, vector<512x32xf32>, vector<8x512xf32> -> vector<8x512xf32>
    %c0_4 = arith.constant 0 : index
    %c0_5 = arith.constant 0 : index
    %4 = vector.load %arg3[%c0_4, %c0_5] : memref<1x512xf32, #tpu.memory_space<vmem>>, vector<1x512xf32>
    %5 = vector.broadcast %4 : vector<1x512xf32> to vector<8x512xf32>
    %6 = arith.addf %3, %5 : vector<8x512xf32>
    %cst_6 = arith.constant 0.000000e+00 : f32
    %7 = vector.broadcast %cst_6 : f32 to vector<8x512xf32>
    %8 = arith.maximumf %6, %7 : vector<8x512xf32>
    %c0_7 = arith.constant 0 : index
    %c0_8 = arith.constant 0 : index
    %9 = vector.load %arg4[%c0_7, %c0_8] : memref<32x512xf32, #tpu.memory_space<vmem>>, vector<32x512xf32>
    %cst_9 = arith.constant dense<0.000000e+00> : vector<8x32xf32>
    %10 = tpu.matmul %8, %9, %cst_9 {dimension_numbers = #tpu.dot_dimension_numbers<[1], [1], [0], [0], [0, 0, 1, 0], [], []>} : vector<8x512xf32>, vector<32x512xf32>, vector<8x32xf32> -> vector<8x32xf32>
    %c0_10 = arith.constant 0 : index
    %c0_11 = arith.constant 0 : index
    %11 = vector.load %arg5[%c0_10, %c0_11] : memref<1x32xf32, #tpu.memory_space<vmem>>, vector<1x32xf32>
    %12 = vector.broadcast %11 : vector<1x32xf32> to vector<8x32xf32>
    %13 = arith.addf %10, %12 : vector<8x32xf32>
    %cst_12 = arith.constant dense<0.000000e+00> : vector<8xf32>
    %14 = vector.multi_reduction <add>, %13, %cst_12 [1] : vector<8x32xf32> to vector<8xf32>
    %15 = vector.shape_cast %14 : vector<8xf32> to vector<8x1xf32>
    %cst_13 = arith.constant 3.200000e+01 : f32
    %16 = vector.broadcast %cst_13 : f32 to vector<8x1xf32>
    %17 = arith.divf %15, %16 : vector<8x1xf32>
    %18 = vector.broadcast %17 : vector<8x1xf32> to vector<8x32xf32>
    %19 = arith.subf %13, %18 : vector<8x32xf32>
    %20 = arith.mulf %19, %19 : vector<8x32xf32>
    %cst_14 = arith.constant dense<0.000000e+00> : vector<8xf32>
    %21 = vector.multi_reduction <add>, %20, %cst_14 [1] : vector<8x32xf32> to vector<8xf32>
    %22 = vector.shape_cast %21 : vector<8xf32> to vector<8x1xf32>
    %cst_15 = arith.constant 3.200000e+01 : f32
    %23 = vector.broadcast %cst_15 : f32 to vector<8x1xf32>
    %24 = arith.divf %22, %23 : vector<8x1xf32>
    %cst_16 = arith.constant 9.99999974E-6 : f32
    %25 = vector.broadcast %cst_16 : f32 to vector<8x1xf32>
    %26 = arith.addf %24, %25 : vector<8x1xf32>
    %27 = math.rsqrt %26 : vector<8x1xf32>
    %28 = vector.broadcast %27 : vector<8x1xf32> to vector<8x32xf32>
    %29 = arith.mulf %19, %28 : vector<8x32xf32>
    %c0_17 = arith.constant 0 : index
    %c0_18 = arith.constant 0 : index
    %30 = vector.load %arg6[%c0_17, %c0_18] : memref<1x32xf32, #tpu.memory_space<vmem>>, vector<1x32xf32>
    %31 = vector.broadcast %30 : vector<1x32xf32> to vector<8x32xf32>
    %32 = arith.mulf %29, %31 : vector<8x32xf32>
    %c0_19 = arith.constant 0 : index
    %c0_20 = arith.constant 0 : index
    %33 = vector.load %arg7[%c0_19, %c0_20] : memref<1x32xf32, #tpu.memory_space<vmem>>, vector<1x32xf32>
    %34 = vector.broadcast %33 : vector<1x32xf32> to vector<8x32xf32>
    %35 = arith.addf %32, %34 : vector<8x32xf32>
    %c0_21 = arith.constant 0 : index
    %c0_22 = arith.constant 0 : index
    %c0_23 = arith.constant 0 : index
    %36 = vector.load %arg8[%c0_21, %c0_22, %c0_23] : memref<1x8x32xf32, #tpu.memory_space<vmem>>, vector<1x8x32xf32>
    %37 = vector.shape_cast %36 : vector<1x8x32xf32> to vector<8x32xf32>
    %38 = vector.shape_cast %35 : vector<8x32xf32> to vector<1x8x32xf32>
    tpu.vector_store %arg8[%c0_21, %c0_22, %c0_23], %38 {strides = array<i32>} : memref<1x8x32xf32, #tpu.memory_space<vmem>>, vector<1x8x32xf32>,
    return
  }
  func.func @transform_0(%arg0: i32) -> (i32, i32, i32) {
    %c0_i32 = arith.constant 0 : i32
    %c0_i32_0 = arith.constant 0 : i32
    %c0_i32_1 = arith.constant 0 : i32
    return %arg0, %c0_i32, %c0_i32_0 : i32, i32, i32
  }
  func.func @transform_1(%arg0: i32) -> (i32, i32) {
    %c0_i32 = arith.constant 0 : i32
    %c0_i32_0 = arith.constant 0 : i32
    %c0_i32_1 = arith.constant 0 : i32
    return %c0_i32, %c0_i32_0 : i32, i32
  }
  func.func @transform_2(%arg0: i32) -> (i32, i32) {
    %c0_i32 = arith.constant 0 : i32
    %c0_i32_0 = arith.constant 0 : i32
    %c0_i32_1 = arith.constant 0 : i32
    return %c0_i32, %c0_i32_0 : i32, i32
  }
  func.func @transform_3(%arg0: i32) -> (i32, i32) {
    %c0_i32 = arith.constant 0 : i32
    %c0_i32_0 = arith.constant 0 : i32
    %c0_i32_1 = arith.constant 0 : i32
    return %c0_i32, %c0_i32_0 : i32, i32
  }
  func.func @transform_4(%arg0: i32) -> (i32, i32) {
    %c0_i32 = arith.constant 0 : i32
    %c0_i32_0 = arith.constant 0 : i32
    %c0_i32_1 = arith.constant 0 : i32
    return %c0_i32, %c0_i32_0 : i32, i32
  }
  func.func @transform_5(%arg0: i32) -> (i32, i32) {
    %c0_i32 = arith.constant 0 : i32
    %c0_i32_0 = arith.constant 0 : i32
    %c0_i32_1 = arith.constant 0 : i32
    return %c0_i32, %c0_i32_0 : i32, i32
  }
  func.func @transform_6(%arg0: i32) -> (i32, i32) {
    %c0_i32 = arith.constant 0 : i32
    %c0_i32_0 = arith.constant 0 : i32
    %c0_i32_1 = arith.constant 0 : i32
    return %c0_i32, %c0_i32_0 : i32, i32
  }
  func.func @transform_7(%arg0: i32) -> (i32, i32, i32) {
    %c0_i32 = arith.constant 0 : i32
    %c0_i32_0 = arith.constant 0 : i32
    %c0_i32_1 = arith.constant 0 : i32
    return %arg0, %c0_i32, %c0_i32_0 : i32, i32, i32
  }
}

module attributes {stable_mosaic.version = 11 : i64} {
  func.func @kernel(%arg0: i32, %arg1: memref<1x8x32xf32, #tpu.memory_space<vmem>>, %arg2: memref<1x12x32xf32, #tpu.memory_space<vmem>>, %arg3: memref<32x32xf32, #tpu.memory_space<vmem>>, %arg4: memref<1x32xf32, #tpu.memory_space<vmem>>, %arg5: memref<64x32xf32, #tpu.memory_space<vmem>>, %arg6: memref<1x64xf32, #tpu.memory_space<vmem>>, %arg7: memref<32x32xf32, #tpu.memory_space<vmem>>, %arg8: memref<1x32xf32, #tpu.memory_space<vmem>>, %arg9: memref<1x8x32xf32, #tpu.memory_space<vmem>>) attributes {dimension_semantics = [#tpu.dimension_semantics<parallel>], iteration_bounds = array<i64: 2>, scalar_prefetch = 0 : i64, scratch_operands = 0 : i64, tpu.core_type = #tpu.core_type<tc>, window_params = [{transform_indices = @transform_0, window_bounds = array<i64: 1, 8, 32>}, {transform_indices = @transform_1, window_bounds = array<i64: 1, 12, 32>}, {pipeline_mode = #tpu.pipeline_mode<synchronous>, transform_indices = @transform_2, window_bounds = array<i64: 32, 32>}, {pipeline_mode = #tpu.pipeline_mode<synchronous>, transform_indices = @transform_3, window_bounds = array<i64: 1, 32>}, {pipeline_mode = #tpu.pipeline_mode<synchronous>, transform_indices = @transform_4, window_bounds = array<i64: 64, 32>}, {pipeline_mode = #tpu.pipeline_mode<synchronous>, transform_indices = @transform_5, window_bounds = array<i64: 1, 64>}, {pipeline_mode = #tpu.pipeline_mode<synchronous>, transform_indices = @transform_6, window_bounds = array<i64: 32, 32>}, {pipeline_mode = #tpu.pipeline_mode<synchronous>, transform_indices = @transform_7, window_bounds = array<i64: 1, 32>}, {transform_indices = @transform_8, window_bounds = array<i64: 1, 8, 32>}]} {
    %c0 = arith.constant 0 : index
    %c0_0 = arith.constant 0 : index
    %c0_1 = arith.constant 0 : index
    %0 = vector.load %arg1[%c0, %c0_0, %c0_1] : memref<1x8x32xf32, #tpu.memory_space<vmem>>, vector<1x8x32xf32>
    %1 = vector.shape_cast %0 : vector<1x8x32xf32> to vector<8x32xf32>
    %c0_2 = arith.constant 0 : index
    %c0_3 = arith.constant 0 : index
    %c0_4 = arith.constant 0 : index
    %2 = vector.load %arg2[%c0_2, %c0_3, %c0_4] : memref<1x12x32xf32, #tpu.memory_space<vmem>>, vector<1x12x32xf32>
    %3 = vector.shape_cast %2 : vector<1x12x32xf32> to vector<12x32xf32>
    %c0_5 = arith.constant 0 : index
    %c0_6 = arith.constant 0 : index
    %4 = vector.load %arg3[%c0_5, %c0_6] : memref<32x32xf32, #tpu.memory_space<vmem>>, vector<32x32xf32>
    %cst = arith.constant dense<0.000000e+00> : vector<8x32xf32>
    %5 = tpu.matmul %1, %4, %cst {dimension_numbers = #tpu.dot_dimension_numbers<[1], [1], [0], [0], [0, 0, 1, 0], [], []>} : vector<8x32xf32>, vector<32x32xf32>, vector<8x32xf32> -> vector<8x32xf32>
    %c0_7 = arith.constant 0 : index
    %c0_8 = arith.constant 0 : index
    %6 = vector.load %arg4[%c0_7, %c0_8] : memref<1x32xf32, #tpu.memory_space<vmem>>, vector<1x32xf32>
    %7 = vector.broadcast %6 : vector<1x32xf32> to vector<8x32xf32>
    %8 = arith.addf %5, %7 : vector<8x32xf32>
    %c0_9 = arith.constant 0 : index
    %c0_10 = arith.constant 0 : index
    %9 = vector.load %arg5[%c0_9, %c0_10] : memref<64x32xf32, #tpu.memory_space<vmem>>, vector<64x32xf32>
    %cst_11 = arith.constant dense<0.000000e+00> : vector<12x64xf32>
    %10 = tpu.matmul %3, %9, %cst_11 {dimension_numbers = #tpu.dot_dimension_numbers<[1], [1], [0], [0], [0, 0, 1, 0], [], []>} : vector<12x32xf32>, vector<64x32xf32>, vector<12x64xf32> -> vector<12x64xf32>
    %c0_12 = arith.constant 0 : index
    %c0_13 = arith.constant 0 : index
    %11 = vector.load %arg6[%c0_12, %c0_13] : memref<1x64xf32, #tpu.memory_space<vmem>>, vector<1x64xf32>
    %12 = vector.broadcast %11 : vector<1x64xf32> to vector<12x64xf32>
    %13 = arith.addf %10, %12 : vector<12x64xf32>
    %14 = vector.extract_strided_slice %13 {offsets = [0, 0], sizes = [12, 32], strides = [1, 1]} : vector<12x64xf32> to vector<12x32xf32>
    %15 = vector.extract_strided_slice %13 {offsets = [0, 32], sizes = [12, 32], strides = [1, 1]} : vector<12x64xf32> to vector<12x32xf32>
    %c0_14 = arith.constant 0 : index
    %c0_15 = arith.constant 0 : index
    %16 = vector.load %arg7[%c0_14, %c0_15] : memref<32x32xf32, #tpu.memory_space<vmem>>, vector<32x32xf32>
    %cst_16 = arith.constant 0.000000e+00 : f32
    %17 = vector.broadcast %cst_16 : f32 to vector<8x32xf32>
    %18 = vector.extract_strided_slice %8 {offsets = [0, 0], sizes = [8, 8], strides = [1, 1]} : vector<8x32xf32> to vector<8x8xf32>
    %cst_17 = arith.constant 0.353553385 : f32
    %19 = vector.broadcast %cst_17 : f32 to vector<8x8xf32>
    %20 = arith.mulf %18, %19 : vector<8x8xf32>
    %21 = vector.extract_strided_slice %14 {offsets = [0, 0], sizes = [12, 8], strides = [1, 1]} : vector<12x32xf32> to vector<12x8xf32>
    %cst_18 = arith.constant dense<0.000000e+00> : vector<8x12xf32>
    %22 = tpu.matmul %20, %21, %cst_18 {dimension_numbers = #tpu.dot_dimension_numbers<[1], [1], [0], [0], [0, 0, 1, 0], [], []>} : vector<8x8xf32>, vector<12x8xf32>, vector<8x12xf32> -> vector<8x12xf32>
    %cst_19 = arith.constant dense<0xFF800000> : vector<8xf32>
    %23 = vector.multi_reduction <maximumf>, %22, %cst_19 [1] : vector<8x12xf32> to vector<8xf32>
    %24 = vector.shape_cast %23 : vector<8xf32> to vector<8x1xf32>
    %25 = vector.broadcast %24 : vector<8x1xf32> to vector<8x12xf32>
    %26 = arith.subf %22, %25 : vector<8x12xf32>
    %27 = math.exp %26 : vector<8x12xf32>
    %cst_20 = arith.constant dense<0.000000e+00> : vector<8xf32>
    %28 = vector.multi_reduction <add>, %27, %cst_20 [1] : vector<8x12xf32> to vector<8xf32>
    %29 = vector.shape_cast %28 : vector<8xf32> to vector<8x1xf32>
    %30 = tpu.reciprocal %29 {approx = true} : vector<8x1xf32> -> vector<8x1xf32>
    %31 = vector.broadcast %30 : vector<8x1xf32> to vector<8x12xf32>
    %32 = arith.mulf %27, %31 : vector<8x12xf32>
    %33 = vector.extract_strided_slice %15 {offsets = [0, 0], sizes = [12, 8], strides = [1, 1]} : vector<12x32xf32> to vector<12x8xf32>
    %cst_21 = arith.constant dense<0.000000e+00> : vector<8x8xf32>
    %34 = tpu.matmul %32, %33, %cst_21 {dimension_numbers = #tpu.dot_dimension_numbers<[1], [0], [0], [1], [0, 0, 1, 1], [], []>} : vector<8x12xf32>, vector<12x8xf32>, vector<8x8xf32> -> vector<8x8xf32>
    %35 = vector.extract_strided_slice %16 {offsets = [0, 0], sizes = [32, 8], strides = [1, 1]} : vector<32x32xf32> to vector<32x8xf32>
    %cst_22 = arith.constant dense<0.000000e+00> : vector<8x32xf32>
    %36 = tpu.matmul %34, %35, %cst_22 {dimension_numbers = #tpu.dot_dimension_numbers<[1], [1], [0], [0], [0, 0, 1, 0], [], []>} : vector<8x8xf32>, vector<32x8xf32>, vector<8x32xf32> -> vector<8x32xf32>
    %37 = arith.addf %17, %36 : vector<8x32xf32>
    %38 = vector.extract_strided_slice %8 {offsets = [0, 8], sizes = [8, 8], strides = [1, 1]} : vector<8x32xf32> to vector<8x8xf32>
    %cst_23 = arith.constant 0.353553385 : f32
    %39 = vector.broadcast %cst_23 : f32 to vector<8x8xf32>
    %40 = arith.mulf %38, %39 : vector<8x8xf32>
    %41 = vector.extract_strided_slice %14 {offsets = [0, 8], sizes = [12, 8], strides = [1, 1]} : vector<12x32xf32> to vector<12x8xf32>
    %cst_24 = arith.constant dense<0.000000e+00> : vector<8x12xf32>
    %42 = tpu.matmul %40, %41, %cst_24 {dimension_numbers = #tpu.dot_dimension_numbers<[1], [1], [0], [0], [0, 0, 1, 0], [], []>} : vector<8x8xf32>, vector<12x8xf32>, vector<8x12xf32> -> vector<8x12xf32>
    %cst_25 = arith.constant dense<0xFF800000> : vector<8xf32>
    %43 = vector.multi_reduction <maximumf>, %42, %cst_25 [1] : vector<8x12xf32> to vector<8xf32>
    %44 = vector.shape_cast %43 : vector<8xf32> to vector<8x1xf32>
    %45 = vector.broadcast %44 : vector<8x1xf32> to vector<8x12xf32>
    %46 = arith.subf %42, %45 : vector<8x12xf32>
    %47 = math.exp %46 : vector<8x12xf32>
    %cst_26 = arith.constant dense<0.000000e+00> : vector<8xf32>
    %48 = vector.multi_reduction <add>, %47, %cst_26 [1] : vector<8x12xf32> to vector<8xf32>
    %49 = vector.shape_cast %48 : vector<8xf32> to vector<8x1xf32>
    %50 = tpu.reciprocal %49 {approx = true} : vector<8x1xf32> -> vector<8x1xf32>
    %51 = vector.broadcast %50 : vector<8x1xf32> to vector<8x12xf32>
    %52 = arith.mulf %47, %51 : vector<8x12xf32>
    %53 = vector.extract_strided_slice %15 {offsets = [0, 8], sizes = [12, 8], strides = [1, 1]} : vector<12x32xf32> to vector<12x8xf32>
    %cst_27 = arith.constant dense<0.000000e+00> : vector<8x8xf32>
    %54 = tpu.matmul %52, %53, %cst_27 {dimension_numbers = #tpu.dot_dimension_numbers<[1], [0], [0], [1], [0, 0, 1, 1], [], []>} : vector<8x12xf32>, vector<12x8xf32>, vector<8x8xf32> -> vector<8x8xf32>
    %55 = vector.extract_strided_slice %16 {offsets = [0, 8], sizes = [32, 8], strides = [1, 1]} : vector<32x32xf32> to vector<32x8xf32>
    %cst_28 = arith.constant dense<0.000000e+00> : vector<8x32xf32>
    %56 = tpu.matmul %54, %55, %cst_28 {dimension_numbers = #tpu.dot_dimension_numbers<[1], [1], [0], [0], [0, 0, 1, 0], [], []>} : vector<8x8xf32>, vector<32x8xf32>, vector<8x32xf32> -> vector<8x32xf32>
    %57 = arith.addf %37, %56 : vector<8x32xf32>
    %58 = vector.extract_strided_slice %8 {offsets = [0, 16], sizes = [8, 8], strides = [1, 1]} : vector<8x32xf32> to vector<8x8xf32>
    %cst_29 = arith.constant 0.353553385 : f32
    %59 = vector.broadcast %cst_29 : f32 to vector<8x8xf32>
    %60 = arith.mulf %58, %59 : vector<8x8xf32>
    %61 = vector.extract_strided_slice %14 {offsets = [0, 16], sizes = [12, 8], strides = [1, 1]} : vector<12x32xf32> to vector<12x8xf32>
    %cst_30 = arith.constant dense<0.000000e+00> : vector<8x12xf32>
    %62 = tpu.matmul %60, %61, %cst_30 {dimension_numbers = #tpu.dot_dimension_numbers<[1], [1], [0], [0], [0, 0, 1, 0], [], []>} : vector<8x8xf32>, vector<12x8xf32>, vector<8x12xf32> -> vector<8x12xf32>
    %cst_31 = arith.constant dense<0xFF800000> : vector<8xf32>
    %63 = vector.multi_reduction <maximumf>, %62, %cst_31 [1] : vector<8x12xf32> to vector<8xf32>
    %64 = vector.shape_cast %63 : vector<8xf32> to vector<8x1xf32>
    %65 = vector.broadcast %64 : vector<8x1xf32> to vector<8x12xf32>
    %66 = arith.subf %62, %65 : vector<8x12xf32>
    %67 = math.exp %66 : vector<8x12xf32>
    %cst_32 = arith.constant dense<0.000000e+00> : vector<8xf32>
    %68 = vector.multi_reduction <add>, %67, %cst_32 [1] : vector<8x12xf32> to vector<8xf32>
    %69 = vector.shape_cast %68 : vector<8xf32> to vector<8x1xf32>
    %70 = tpu.reciprocal %69 {approx = true} : vector<8x1xf32> -> vector<8x1xf32>
    %71 = vector.broadcast %70 : vector<8x1xf32> to vector<8x12xf32>
    %72 = arith.mulf %67, %71 : vector<8x12xf32>
    %73 = vector.extract_strided_slice %15 {offsets = [0, 16], sizes = [12, 8], strides = [1, 1]} : vector<12x32xf32> to vector<12x8xf32>
    %cst_33 = arith.constant dense<0.000000e+00> : vector<8x8xf32>
    %74 = tpu.matmul %72, %73, %cst_33 {dimension_numbers = #tpu.dot_dimension_numbers<[1], [0], [0], [1], [0, 0, 1, 1], [], []>} : vector<8x12xf32>, vector<12x8xf32>, vector<8x8xf32> -> vector<8x8xf32>
    %75 = vector.extract_strided_slice %16 {offsets = [0, 16], sizes = [32, 8], strides = [1, 1]} : vector<32x32xf32> to vector<32x8xf32>
    %cst_34 = arith.constant dense<0.000000e+00> : vector<8x32xf32>
    %76 = tpu.matmul %74, %75, %cst_34 {dimension_numbers = #tpu.dot_dimension_numbers<[1], [1], [0], [0], [0, 0, 1, 0], [], []>} : vector<8x8xf32>, vector<32x8xf32>, vector<8x32xf32> -> vector<8x32xf32>
    %77 = arith.addf %57, %76 : vector<8x32xf32>
    %78 = vector.extract_strided_slice %8 {offsets = [0, 24], sizes = [8, 8], strides = [1, 1]} : vector<8x32xf32> to vector<8x8xf32>
    %cst_35 = arith.constant 0.353553385 : f32
    %79 = vector.broadcast %cst_35 : f32 to vector<8x8xf32>
    %80 = arith.mulf %78, %79 : vector<8x8xf32>
    %81 = vector.extract_strided_slice %14 {offsets = [0, 24], sizes = [12, 8], strides = [1, 1]} : vector<12x32xf32> to vector<12x8xf32>
    %cst_36 = arith.constant dense<0.000000e+00> : vector<8x12xf32>
    %82 = tpu.matmul %80, %81, %cst_36 {dimension_numbers = #tpu.dot_dimension_numbers<[1], [1], [0], [0], [0, 0, 1, 0], [], []>} : vector<8x8xf32>, vector<12x8xf32>, vector<8x12xf32> -> vector<8x12xf32>
    %cst_37 = arith.constant dense<0xFF800000> : vector<8xf32>
    %83 = vector.multi_reduction <maximumf>, %82, %cst_37 [1] : vector<8x12xf32> to vector<8xf32>
    %84 = vector.shape_cast %83 : vector<8xf32> to vector<8x1xf32>
    %85 = vector.broadcast %84 : vector<8x1xf32> to vector<8x12xf32>
    %86 = arith.subf %82, %85 : vector<8x12xf32>
    %87 = math.exp %86 : vector<8x12xf32>
    %cst_38 = arith.constant dense<0.000000e+00> : vector<8xf32>
    %88 = vector.multi_reduction <add>, %87, %cst_38 [1] : vector<8x12xf32> to vector<8xf32>
    %89 = vector.shape_cast %88 : vector<8xf32> to vector<8x1xf32>
    %90 = tpu.reciprocal %89 {approx = true} : vector<8x1xf32> -> vector<8x1xf32>
    %91 = vector.broadcast %90 : vector<8x1xf32> to vector<8x12xf32>
    %92 = arith.mulf %87, %91 : vector<8x12xf32>
    %93 = vector.extract_strided_slice %15 {offsets = [0, 24], sizes = [12, 8], strides = [1, 1]} : vector<12x32xf32> to vector<12x8xf32>
    %cst_39 = arith.constant dense<0.000000e+00> : vector<8x8xf32>
    %94 = tpu.matmul %92, %93, %cst_39 {dimension_numbers = #tpu.dot_dimension_numbers<[1], [0], [0], [1], [0, 0, 1, 1], [], []>} : vector<8x12xf32>, vector<12x8xf32>, vector<8x8xf32> -> vector<8x8xf32>
    %95 = vector.extract_strided_slice %16 {offsets = [0, 24], sizes = [32, 8], strides = [1, 1]} : vector<32x32xf32> to vector<32x8xf32>
    %cst_40 = arith.constant dense<0.000000e+00> : vector<8x32xf32>
    %96 = tpu.matmul %94, %95, %cst_40 {dimension_numbers = #tpu.dot_dimension_numbers<[1], [1], [0], [0], [0, 0, 1, 0], [], []>} : vector<8x8xf32>, vector<32x8xf32>, vector<8x32xf32> -> vector<8x32xf32>
    %97 = arith.addf %77, %96 : vector<8x32xf32>
    %c0_41 = arith.constant 0 : index
    %c0_42 = arith.constant 0 : index
    %98 = vector.load %arg8[%c0_41, %c0_42] : memref<1x32xf32, #tpu.memory_space<vmem>>, vector<1x32xf32>
    %99 = vector.broadcast %98 : vector<1x32xf32> to vector<8x32xf32>
    %100 = arith.addf %97, %99 : vector<8x32xf32>
    %c0_43 = arith.constant 0 : index
    %c0_44 = arith.constant 0 : index
    %c0_45 = arith.constant 0 : index
    %101 = vector.load %arg9[%c0_43, %c0_44, %c0_45] : memref<1x8x32xf32, #tpu.memory_space<vmem>>, vector<1x8x32xf32>
    %102 = vector.shape_cast %101 : vector<1x8x32xf32> to vector<8x32xf32>
    %103 = vector.shape_cast %100 : vector<8x32xf32> to vector<1x8x32xf32>
    tpu.vector_store %arg9[%c0_43, %c0_44, %c0_45], %103 {strides = array<i32>} : memref<1x8x32xf32, #tpu.memory_space<vmem>>, vector<1x8x32xf32>,
    return
  }
  func.func @transform_0(%arg0: i32) -> (i32, i32, i32) {
    %c0_i32 = arith.constant 0 : i32
    %c0_i32_0 = arith.constant 0 : i32
    %c0_i32_1 = arith.constant 0 : i32
    return %arg0, %c0_i32, %c0_i32_0 : i32, i32, i32
  }
  func.func @transform_1(%arg0: i32) -> (i32, i32, i32) {
    %c0_i32 = arith.constant 0 : i32
    %c0_i32_0 = arith.constant 0 : i32
    %c0_i32_1 = arith.constant 0 : i32
    return %arg0, %c0_i32, %c0_i32_0 : i32, i32, i32
  }
  func.func @transform_2(%arg0: i32) -> (i32, i32) {
    %c0_i32 = arith.constant 0 : i32
    %c0_i32_0 = arith.constant 0 : i32
    %c0_i32_1 = arith.constant 0 : i32
    return %c0_i32, %c0_i32_0 : i32, i32
  }
  func.func @transform_3(%arg0: i32) -> (i32, i32) {
    %c0_i32 = arith.constant 0 : i32
    %c0_i32_0 = arith.constant 0 : i32
    %c0_i32_1 = arith.constant 0 : i32
    return %c0_i32, %c0_i32_0 : i32, i32
  }
  func.func @transform_4(%arg0: i32) -> (i32, i32) {
    %c0_i32 = arith.constant 0 : i32
    %c0_i32_0 = arith.constant 0 : i32
    %c0_i32_1 = arith.constant 0 : i32
    return %c0_i32, %c0_i32_0 : i32, i32
  }
  func.func @transform_5(%arg0: i32) -> (i32, i32) {
    %c0_i32 = arith.constant 0 : i32
    %c0_i32_0 = arith.constant 0 : i32
    %c0_i32_1 = arith.constant 0 : i32
    return %c0_i32, %c0_i32_0 : i32, i32
  }
  func.func @transform_6(%arg0: i32) -> (i32, i32) {
    %c0_i32 = arith.constant 0 : i32
    %c0_i32_0 = arith.constant 0 : i32
    %c0_i32_1 = arith.constant 0 : i32
    return %c0_i32, %c0_i32_0 : i32, i32
  }
  func.func @transform_7(%arg0: i32) -> (i32, i32) {
    %c0_i32 = arith.constant 0 : i32
    %c0_i32_0 = arith.constant 0 : i32
    %c0_i32_1 = arith.constant 0 : i32
    return %c0_i32, %c0_i32_0 : i32, i32
  }
  func.func @transform_8(%arg0: i32) -> (i32, i32, i32) {
    %c0_i32 = arith.constant 0 : i32
    %c0_i32_0 = arith.constant 0 : i32
    %c0_i32_1 = arith.constant 0 : i32
    return %arg0, %c0_i32, %c0_i32_0 : i32, i32, i32
  }
}

module attributes {stable_mosaic.version = 11 : i64} {
  func.func @kernel(%arg0: i32, %arg1: memref<1x8x32xf32, #tpu.memory_space<vmem>>, %arg2: memref<32x32xf32, #tpu.memory_space<vmem>>, %arg3: memref<1x32xf32, #tpu.memory_space<vmem>>, %arg4: memref<16x32xf32, #tpu.memory_space<vmem>>, %arg5: memref<1x16xf32, #tpu.memory_space<vmem>>, %arg6: memref<1x8x16xf32, #tpu.memory_space<vmem>>) attributes {dimension_semantics = [#tpu.dimension_semantics<parallel>], iteration_bounds = array<i64: 2>, scalar_prefetch = 0 : i64, scratch_operands = 0 : i64, tpu.core_type = #tpu.core_type<tc>, window_params = [{transform_indices = @transform_0, window_bounds = array<i64: 1, 8, 32>}, {pipeline_mode = #tpu.pipeline_mode<synchronous>, transform_indices = @transform_1, window_bounds = array<i64: 32, 32>}, {pipeline_mode = #tpu.pipeline_mode<synchronous>, transform_indices = @transform_2, window_bounds = array<i64: 1, 32>}, {pipeline_mode = #tpu.pipeline_mode<synchronous>, transform_indices = @transform_3, window_bounds = array<i64: 16, 32>}, {pipeline_mode = #tpu.pipeline_mode<synchronous>, transform_indices = @transform_4, window_bounds = array<i64: 1, 16>}, {transform_indices = @transform_5, window_bounds = array<i64: 1, 8, 16>}]} {
    %c0 = arith.constant 0 : index
    %c0_0 = arith.constant 0 : index
    %c0_1 = arith.constant 0 : index
    %0 = vector.load %arg1[%c0, %c0_0, %c0_1] : memref<1x8x32xf32, #tpu.memory_space<vmem>>, vector<1x8x32xf32>
    %1 = vector.shape_cast %0 : vector<1x8x32xf32> to vector<8x32xf32>
    %c0_2 = arith.constant 0 : index
    %c0_3 = arith.constant 0 : index
    %2 = vector.load %arg2[%c0_2, %c0_3] : memref<32x32xf32, #tpu.memory_space<vmem>>, vector<32x32xf32>
    %cst = arith.constant dense<0.000000e+00> : vector<8x32xf32>
    %3 = tpu.matmul %1, %2, %cst {dimension_numbers = #tpu.dot_dimension_numbers<[1], [1], [0], [0], [0, 0, 1, 0], [], []>} : vector<8x32xf32>, vector<32x32xf32>, vector<8x32xf32> -> vector<8x32xf32>
    %c0_4 = arith.constant 0 : index
    %c0_5 = arith.constant 0 : index
    %4 = vector.load %arg3[%c0_4, %c0_5] : memref<1x32xf32, #tpu.memory_space<vmem>>, vector<1x32xf32>
    %5 = vector.broadcast %4 : vector<1x32xf32> to vector<8x32xf32>
    %6 = arith.addf %3, %5 : vector<8x32xf32>
    %cst_6 = arith.constant 0.000000e+00 : f32
    %7 = vector.broadcast %cst_6 : f32 to vector<8x32xf32>
    %8 = arith.cmpf ogt, %6, %7 : vector<8x32xf32>
    %cst_7 = arith.constant 0.00999999977 : f32
    %9 = vector.broadcast %cst_7 : f32 to vector<8x32xf32>
    %10 = arith.mulf %9, %6 : vector<8x32xf32>
    %11 = arith.select %8, %6, %10 : vector<8x32xi1>, vector<8x32xf32>
    %c0_8 = arith.constant 0 : index
    %c0_9 = arith.constant 0 : index
    %12 = vector.load %arg4[%c0_8, %c0_9] : memref<16x32xf32, #tpu.memory_space<vmem>>, vector<16x32xf32>
    %cst_10 = arith.constant dense<0.000000e+00> : vector<8x16xf32>
    %13 = tpu.matmul %11, %12, %cst_10 {dimension_numbers = #tpu.dot_dimension_numbers<[1], [1], [0], [0], [0, 0, 1, 0], [], []>} : vector<8x32xf32>, vector<16x32xf32>, vector<8x16xf32> -> vector<8x16xf32>
    %c0_11 = arith.constant 0 : index
    %c0_12 = arith.constant 0 : index
    %14 = vector.load %arg5[%c0_11, %c0_12] : memref<1x16xf32, #tpu.memory_space<vmem>>, vector<1x16xf32>
    %15 = vector.broadcast %14 : vector<1x16xf32> to vector<8x16xf32>
    %16 = arith.addf %13, %15 : vector<8x16xf32>
    %c0_13 = arith.constant 0 : index
    %c0_14 = arith.constant 0 : index
    %c0_15 = arith.constant 0 : index
    %17 = vector.load %arg6[%c0_13, %c0_14, %c0_15] : memref<1x8x16xf32, #tpu.memory_space<vmem>>, vector<1x8x16xf32>
    %18 = vector.shape_cast %17 : vector<1x8x16xf32> to vector<8x16xf32>
    %19 = vector.shape_cast %16 : vector<8x16xf32> to vector<1x8x16xf32>
    tpu.vector_store %arg6[%c0_13, %c0_14, %c0_15], %19 {strides = array<i32>} : memref<1x8x16xf32, #tpu.memory_space<vmem>>, vector<1x8x16xf32>,
    return
  }
  func.func @transform_0(%arg0: i32) -> (i32, i32, i32) {
    %c0_i32 = arith.constant 0 : i32
    %c0_i32_0 = arith.constant 0 : i32
    %c0_i32_1 = arith.constant 0 : i32
    return %arg0, %c0_i32, %c0_i32_0 : i32, i32, i32
  }
  func.func @transform_1(%arg0: i32) -> (i32, i32) {
    %c0_i32 = arith.constant 0 : i32
    %c0_i32_0 = arith.constant 0 : i32
    %c0_i32_1 = arith.constant 0 : i32
    return %c0_i32, %c0_i32_0 : i32, i32
  }
  func.func @transform_2(%arg0: i32) -> (i32, i32) {
    %c0_i32 = arith.constant 0 : i32
    %c0_i32_0 = arith.constant 0 : i32
    %c0_i32_1 = arith.constant 0 : i32
    return %c0_i32, %c0_i32_0 : i32, i32
  }
  func.func @transform_3(%arg0: i32) -> (i32, i32) {
    %c0_i32 = arith.constant 0 : i32
    %c0_i32_0 = arith.constant 0 : i32
    %c0_i32_1 = arith.constant 0 : i32
    return %c0_i32, %c0_i32_0 : i32, i32
  }
  func.func @transform_4(%arg0: i32) -> (i32, i32) {
    %c0_i32 = arith.constant 0 : i32
    %c0_i32_0 = arith.constant 0 : i32
    %c0_i32_1 = arith.constant 0 : i32
    return %c0_i32, %c0_i32_0 : i32, i32
  }
  func.func @transform_5(%arg0: i32) -> (i32, i32, i32) {
    %c0_i32 = arith.constant 0 : i32
    %c0_i32_0 = arith.constant 0 : i32
    %c0_i32_1 = arith.constant 0 : i32
    return %arg0, %c0_i32, %c0_i32_0 : i32, i32, i32
  }
}

</mosaic_0001>

<bundles_post_ra>
// kernel: decoder_forward_pallas.9
= control target key start
LH: loop header
LB: loop body
LE: loop exit
PB: predicated region body
PF: predicated region fallthrough
CT: control target
= control target key end

     0   :  { %s1268_s24 = smov 0   ;;  %s1631_s0 = inlined_call_operand.vmem [shape: f32[2,8,32], index: 0, kind: input, shape index: {}]   ;;  %s1632_s1 = inlined_call_operand.vmem [shape: f32[512,32], index: 1, kind: input, shape index: {}]   ;;  %s1633_s2 = inlined_call_operand.vmem [shape: f32[1,512], index: 2, kind: input, shape index: {}]   ;;  %s1634_s3 = inlined_call_operand.vmem [shape: f32[32,512], index: 3, kind: input, shape index: {}]   ;;  %s1635_s4 = inlined_call_operand.vmem [shape: f32[1,32], index: 4, kind: input, shape index: {}]   ;;  %s1636_s5 = inlined_call_operand.vmem [shape: f32[1,32], index: 5, kind: input, shape index: {}]   ;;  %s1637_s6 = inlined_call_operand.vmem [shape: f32[1,32], index: 6, kind: input, shape index: {}]   ;;  %s1638_s7 = inlined_call_operand.vmem [shape: f32[2,8,32], index: 7, kind: output, shape index: {}]  }
   0x1 LB: > { %s950_s25 = sadd.s32 4294967295, %s1226_s24   ;;  %p954_p0 = scmp.ge.s32.totalorder %s1226_s24, 1  ;;  %s1226_s24 = sphi %s1268_s24, %s17_s24  }
   0x2   : > { %p236_p1 = scmp.lt.s32.totalorder %s1226_s24, 3 }
   0x4   : > { %p237_p2 = pnand %p954_p0, %p236_p1 }
   0x5   : > { %v291_v0 = vld [vmem:[%s1632_s1 + $0x80] sm:$0xff] (!%p237_p2)  ;;  %v292_v1 = vld [vmem:[%s1632_s1 + $0x88] sm:$0xff] (!%p237_p2)  ;;  %vm361_vm0 = vcmask (!%p237_p2), 261120   ;;  %v293_v13 = vld [vmem:[%s1632_s1 + $0x90] sm:$0xff] (!%p237_p2)  ;;  %p266_p3 = scmp.lt.s32.totalorder (!%p237_p2), %s950_s25, 1 }
   0x6   : > { %240 = sbr.rel (%p237_p2) target bundleno = 821 (0x335), region = 48  ;;  %v323_v2 = vld [vmem:[%s1632_s1 + $0x180] sm:$0xff] (!%p237_p2)  ;;  %v1096_v3 = vpack.c.bf16 (!%p237_p2), %v292_v1, %v291_v0  ;;  %vm1287_vm1 = vmpackc.low (!%p237_p2), %vm361_vm0, %vm361_vm0  ;;  %v324_v5 = vld [vmem:[%s1632_s1 + $0x188] sm:$0xff] (!%p237_p2) }
   0x7   : > { %v275_v6 = vld [vmem:[%s1632_s1] sm:$0xff] (!%p237_p2)  ;;  %v1144_v7 = vpack.c.bf16 (!%p237_p2), %v324_v5, %v323_v2  ;;  %v276_v8 = vld [vmem:[%s1632_s1 + $0x8] sm:$0xff] (!%p237_p2)  ;;  %v294_v14 = vld [vmem:[%s1632_s1 + $0x98] sm:$0xff] (!%p237_p2) }
   0x8   : > { %v307_v9 = vld [vmem:[%s1632_s1 + $0x100] sm:$0xff] (!%p237_p2)  ;;  %v308_v10 = vld [vmem:[%s1632_s1 + $0x108] sm:$0xff] (!%p237_p2)  ;;  %1098 = vmatprep.subr.msk.bf16.mxu0 (!%p237_p2), %vm1287_vm1, %v1096_v3  ;;  %v1099_v11 = vpack.c.bf16 (!%p237_p2), %v276_v8, %v275_v6  ;;  %v325_v15 = vld [vmem:[%s1632_s1 + $0x190] sm:$0xff] (!%p237_p2)  ;;  %v1102_v16 = vpack.c.bf16 (!%p237_p2), %v294_v14, %v293_v13 }
   0x9   : > { %v1147_v12 = vpack.c.bf16 (!%p237_p2), %v308_v10, %v307_v9  ;;  %1146 = vmatprep.subr.msk.bf16.mxu1 (!%p237_p2), %vm1287_vm1, %v1144_v7  ;;  %v326_v17 = vld [vmem:[%s1632_s1 + $0x198] sm:$0xff] (!%p237_p2)  ;;  %v277_v19 = vld [vmem:[%s1632_s1 + $0x10] sm:$0xff] (!%p237_p2)  ;;  %v295_v23 = vld [vmem:[%s1632_s1 + $0xa0] sm:$0xff] (!%p237_p2) }
   0xa   : > { %1101 = vmatpush3.bf16.xpose.msk.msra.mxu0 (!%p237_p2), %vm1287_vm1, %v1099_v11  ;;  %v1150_v18 = vpack.c.bf16 (!%p237_p2), %v326_v17, %v325_v15  ;;  %v278_v20 = vld [vmem:[%s1632_s1 + $0x18] sm:$0xff] (!%p237_p2)  ;;  %v309_v21 = vld [vmem:[%s1632_s1 + $0x110] sm:$0xff] (!%p237_p2)  ;;  %v296_v24 = vld [vmem:[%s1632_s1 + $0xa8] sm:$0xff] (!%p237_p2) }
   0xb   : > { %1149 = vmatpush3.bf16.xpose.msk.msra.mxu1 (!%p237_p2), %vm1287_vm1, %v1147_v12  ;;  %1104 = vmatprep.subr.msk.bf16.mxu0 (!%p237_p2), %vm1287_vm1, %v1102_v16  ;;  %v310_v22 = vld [vmem:[%s1632_s1 + $0x118] sm:$0xff] (!%p237_p2)  ;;  %v327_v25 = vld [vmem:[%s1632_s1 + $0x1a0] sm:$0xff] (!%p237_p2)  ;;  %v328_v26 = vld [vmem:[%s1632_s1 + $0x1a8] sm:$0xff] (!%p237_p2)  ;;  %v1105_v27 = vpack.c.bf16 (!%p237_p2), %v278_v20, %v277_v19  ;;  %v1108_v29 = vpack.c.bf16 (!%p237_p2), %v296_v24, %v295_v23 }
   0xc   : > { %1152 = vmatprep.subr.msk.bf16.mxu1 (!%p237_p2), %vm1287_vm1, %v1150_v18  ;;  %v1153_v28 = vpack.c.bf16 (!%p237_p2), %v310_v22, %v309_v21  ;;  %v1156_v30 = vpack.c.bf16 (!%p237_p2), %v328_v26, %v327_v25  ;;  %v279_v31 = vld [vmem:[%s1632_s1 + $0x20] sm:$0xff] (!%p237_p2)  ;;  %v280_v32 = vld [vmem:[%s1632_s1 + $0x28] sm:$0xff] (!%p237_p2)  ;;  %v297_v35 = vld [vmem:[%s1632_s1 + $0xb0] sm:$0xff] (!%p237_p2) }
   0xd   : > { %s1642_s25 = smov (!%p266_p3, %s950_s25), 1  ;;  %v311_v33 = vld [vmem:[%s1632_s1 + $0x120] sm:$0xff]  ;;  %v312_v34 = vld [vmem:[%s1632_s1 + $0x128] sm:$0xff]  ;;  %v298_v36 = vld [vmem:[%s1632_s1 + $0xb8] sm:$0xff]  ;;  %v1111_v39 = vpack.c.bf16 %v280_v32, %v279_v31 }
   0xe   : > { %v329_v37 = vld [vmem:[%s1632_s1 + $0x1b0] sm:$0xff]  ;;  %v330_v38 = vld [vmem:[%s1632_s1 + $0x1b8] sm:$0xff]  ;;  %s955_s17 = sshll.u32 %s1642_s25, 3  ;;  %v1159_v40 = vpack.c.bf16 %v312_v34, %v311_v33  ;;  %v1114_v41 = vpack.c.bf16 %v298_v36, %v297_v35  ;;  %v299_v48 = vld [vmem:[%s1632_s1 + $0xc0] sm:$0xff] }
   0xf   : > { %v1162_v42 = vpack.c.bf16 %v330_v38, %v329_v37  ;;  %s269_s20 = scalar_lea.vmem %s1631_s0, %s955_s17  ;;  %v281_v43 = vld [vmem:[%s1632_s1 + $0x30] sm:$0xff]  ;;  %v282_v44 = vld [vmem:[%s1632_s1 + $0x38] sm:$0xff]  ;;  %v300_v49 = vld [vmem:[%s1632_s1 + $0xc8] sm:$0xff]  ;;  %s273_s14 = scalar_lea.vmem %s1638_s7, %s955_s17 }
  0x10   : > { %v1408_v45 = vld [vmem:[%s269_s20] sm:$0xff]  ;;  %v313_v46 = vld [vmem:[%s1632_s1 + $0x130] sm:$0xff]  ;;  %v314_v47 = vld [vmem:[%s1632_s1 + $0x138] sm:$0xff]  ;;  %v1117_v52 = vpack.c.bf16 %v282_v44, %v281_v43  ;;  %v1120_v54 = vpack.c.bf16 %v300_v49, %v299_v48 }
  0x11   : > { %v331_v50 = vld [vmem:[%s1632_s1 + $0x1c0] sm:$0xff]  ;;  %v332_v51 = vld [vmem:[%s1632_s1 + $0x1c8] sm:$0xff]  ;;  %1060 = vmatprep.mubr.msk.f32.mxu0 %vm361_vm0, %v1408_v45  ;;  %1094 = vmatprep.mubr.msk.f32.mxu1 %vm361_vm0, %v1408_v45  ;;  %v1165_v53 = vpack.c.bf16 %v314_v47, %v313_v46  ;;  %v301_v60 = vld [vmem:[%s1632_s1 + $0xd0] sm:$0xff] }
  0x12   : > { %1107 = vmatpush3.bf16.xpose.msk.msra.mxu0 %vm1287_vm1, %v1105_v27  ;;  %v1168_v55 = vpack.c.bf16 %v332_v51, %v331_v50  ;;  %v283_v56 = vld [vmem:[%s1632_s1 + $0x40] sm:$0xff]  ;;  %v284_v57 = vld [vmem:[%s1632_s1 + $0x48] sm:$0xff]  ;;  %v302_v61 = vld [vmem:[%s1632_s1 + $0xd8] sm:$0xff] }
  0x13   : > { %1155 = vmatpush3.bf16.xpose.msk.msra.mxu1 %vm1287_vm1, %v1153_v28  ;;  %1110 = vmatprep.subr.msk.bf16.mxu0 %vm1287_vm1, %v1108_v29  ;;  %v315_v58 = vld [vmem:[%s1632_s1 + $0x140] sm:$0xff]  ;;  %v316_v59 = vld [vmem:[%s1632_s1 + $0x148] sm:$0xff]  ;;  %v333_v62 = vld [vmem:[%s1632_s1 + $0x1d0] sm:$0xff]  ;;  %v1123_v0 = vpack.c.bf16 %v284_v57, %v283_v56  ;;  %v1126_v2 = vpack.c.bf16 %v302_v61, %v301_v60 }
  0x14   : > { %1158 = vmatprep.subr.msk.bf16.mxu1 %vm1287_vm1, %v1156_v30  ;;  %v334_v63 = vld [vmem:[%s1632_s1 + $0x1d8] sm:$0xff]  ;;  %v1171_v1 = vpack.c.bf16 %v316_v59, %v315_v58  ;;  %v285_v5 = vld [vmem:[%s1632_s1 + $0x50] sm:$0xff]  ;;  %v303_v9 = vld [vmem:[%s1632_s1 + $0xe0] sm:$0xff]  ;;  %v341_v58 = vlaneseq }
  0x15   : > { %v1174_v3 = vpack.c.bf16 %v334_v63, %v333_v62  ;;  %v286_v6 = vld [vmem:[%s1632_s1 + $0x58] sm:$0xff]  ;;  %v317_v7 = vld [vmem:[%s1632_s1 + $0x150] sm:$0xff]  ;;  %v304_v10 = vld [vmem:[%s1632_s1 + $0xe8] sm:$0xff] }
  0x16   : > { %v318_v8 = vld [vmem:[%s1632_s1 + $0x158] sm:$0xff]  ;;  %v335_v11 = vld [vmem:[%s1632_s1 + $0x1e0] sm:$0xff]  ;;  %v336_v12 = vld [vmem:[%s1632_s1 + $0x1e8] sm:$0xff]  ;;  %v1129_v13 = vpack.c.bf16 %v286_v6, %v285_v5  ;;  %v1132_v15 = vpack.c.bf16 %v304_v10, %v303_v9  ;;  %v342_v59 = vshrl.u32 %v341_v58, 7 }
  0x17   : > { %v1177_v14 = vpack.c.bf16 %v318_v8, %v317_v7  ;;  %v1180_v16 = vpack.c.bf16 %v336_v12, %v335_v11  ;;  %v287_v17 = vld [vmem:[%s1632_s1 + $0x60] sm:$0xff]  ;;  %v288_v18 = vld [vmem:[%s1632_s1 + $0x68] sm:$0xff]  ;;  %v305_v21 = vld [vmem:[%s1632_s1 + $0xf0] sm:$0xff] }
  0x18   : > { %v319_v19 = vld [vmem:[%s1632_s1 + $0x160] sm:$0xff]  ;;  %v320_v20 = vld [vmem:[%s1632_s1 + $0x168] sm:$0xff]  ;;  %v306_v22 = vld [vmem:[%s1632_s1 + $0xf8] sm:$0xff]  ;;  %v1135_v25 = vpack.c.bf16 %v288_v18, %v287_v17  ;;  %v343_v60 = vsub.s32 0, %v342_v59  ;;  %v351_v61 = vsub.s32 2, %v342_v59  ;;  %v347_v63 = vsub.s32 1, %v342_v59 }
  0x19   : > { %v337_v23 = vld [vmem:[%s1632_s1 + $0x1f0] sm:$0xff]  ;;  %v338_v24 = vld [vmem:[%s1632_s1 + $0x1f8] sm:$0xff]  ;;  %v1183_v26 = vpack.c.bf16 %v320_v20, %v319_v19  ;;  %v1138_v27 = vpack.c.bf16 %v306_v22, %v305_v21  ;;  %v704_v33 = vld [vmem:[%s1634_s3 + $0x8] sm:$0xff] }
  0x1a   : > { %1113 = vmatpush3.bf16.xpose.msk.msra.mxu0 %vm1287_vm1, %v1111_v39  ;;  %v1186_v28 = vpack.c.bf16 %v338_v24, %v337_v23  ;;  %v289_v29 = vld [vmem:[%s1632_s1 + $0x70] sm:$0xff]  ;;  %v290_v30 = vld [vmem:[%s1632_s1 + $0x78] sm:$0xff]  ;;  %v708_v34 = vld [vmem:[%s1634_s3 + $0x28] sm:$0xff] }
  0x1b   : > { %1161 = vmatpush3.bf16.xpose.msk.msra.mxu1 %vm1287_vm1, %v1159_v40  ;;  %1116 = vmatprep.subr.msk.bf16.mxu0 %vm1287_vm1, %v1114_v41  ;;  %v321_v31 = vld [vmem:[%s1632_s1 + $0x170] sm:$0xff]  ;;  %v322_v32 = vld [vmem:[%s1632_s1 + $0x178] sm:$0xff]  ;;  %v1141_v37 = vpack.c.bf16 %v290_v30, %v289_v29  ;;  %v1192_v39 = vpack.c.bf16 %v708_v34, %v704_v33  ;;  %v703_v41 = vld [vmem:[%s1634_s3] sm:$0xff] }
  0x1c   : > { %1164 = vmatprep.subr.msk.bf16.mxu1 %vm1287_vm1, %v1162_v42  ;;  %v706_v35 = vld [vmem:[%s1634_s3 + $0x18] sm:$0xff]  ;;  %v1189_v38 = vpack.c.bf16 %v322_v32, %v321_v31  ;;  %v707_v42 = vld [vmem:[%s1634_s3 + $0x20] sm:$0xff]  ;;  %v705_v43 = vld [vmem:[%s1634_s3 + $0x10] sm:$0xff] }
  0x1d   : > { %v710_v36 = vld [vmem:[%s1634_s3 + $0x38] sm:$0xff]  ;;  %v709_v44 = vld [vmem:[%s1634_s3 + $0x30] sm:$0xff]  ;;  %v712_v4 = vld [vmem:[%s1634_s3 + $0x48] sm:$0xff]  ;;  %v1194_v49 = vpack.c.bf16 %v707_v42, %v703_v41 }
  0x1e   : > { %v1200_v40 = vpack.c.bf16 %v710_v36, %v706_v35  ;;  %v716_v46 = vld [vmem:[%s1634_s3 + $0x68] sm:$0xff]  ;;  %v714_v47 = vld [vmem:[%s1634_s3 + $0x58] sm:$0xff]  ;;  %v1202_v50 = vpack.c.bf16 %v709_v44, %v705_v43  ;;  %v339_v62 = vld [vmem:[%s1633_s2] sm:$0xf] }
  0x1f   : > { %v718_v48 = vld [vmem:[%s1634_s3 + $0x78] sm:$0xff]  ;;  %v1196_v51 = vpack.c.bf16 %v716_v46, %v712_v4  ;;  %v1023_v18 = vld [vmem:[%s1635_s4] ss:$0 sm:$0xff] }
  0x20   : > { %v1024_v35 = vld [vmem:[%s1636_s5] ss:$0 sm:$0xff] }
  0x22   : > { %1119 = vmatpush3.bf16.xpose.msk.msra.mxu0 %vm1287_vm1, %v1117_v52  ;;  %v1204_v52 = vpack.c.bf16 %v718_v48, %v714_v47 }
  0x23   : > { %1167 = vmatpush3.bf16.xpose.msk.msra.mxu1 %vm1287_vm1, %v1165_v53  ;;  %1122 = vmatprep.subr.msk.bf16.mxu0 %vm1287_vm1, %v1120_v54  ;;  %v711_v53 = vld [vmem:[%s1634_s3 + $0x40] sm:$0xff] }
  0x24   : > { %1170 = vmatprep.subr.msk.bf16.mxu1 %vm1287_vm1, %v1168_v55  ;;  %v715_v54 = vld [vmem:[%s1634_s3 + $0x60] sm:$0xff]  ;;  %v713_v55 = vld [vmem:[%s1634_s3 + $0x50] sm:$0xff] }
  0x25   : > { %v1198_v56 = vpack.c.bf16 %v715_v54, %v711_v53 }
  0x2a   : > { %1125 = vmatpush3.bf16.xpose.msk.msra.mxu0 %vm1287_vm1, %v1123_v0  ;;  %v355_v0 = vsub.s32 3, %v342_v59 }
  0x2b   : > { %1173 = vmatpush3.bf16.xpose.msk.msra.mxu1 %vm1287_vm1, %v1171_v1  ;;  %1128 = vmatprep.subr.msk.bf16.mxu0 %vm1287_vm1, %v1126_v2  ;;  %v344_v1 = vrot.slane %v339_v62, %v343_v60  ;;  %v352_v2 = vrot.slane %v339_v62, %v351_v61 }
  0x2c   : > { %1176 = vmatprep.subr.msk.bf16.mxu1 %vm1287_vm1, %v1174_v3  ;;  %v348_v3 = vrot.slane %v339_v62, %v347_v63  ;;  %v356_v5 = vrot.slane %v339_v62, %v355_v0 }
  0x32   : > { %1131 = vmatpush3.bf16.xpose.msk.msra.mxu0 %vm1287_vm1, %v1129_v13 }
  0x33   : > { %1179 = vmatpush3.bf16.xpose.msk.msra.mxu1 %vm1287_vm1, %v1177_v14  ;;  %1134 = vmatprep.subr.msk.bf16.mxu0 %vm1287_vm1, %v1132_v15 }
  0x34   : > { %1182 = vmatprep.subr.msk.bf16.mxu1 %vm1287_vm1, %v1180_v16 }
  0x3a   : > { %1137 = vmatpush3.bf16.xpose.msk.msra.mxu0 %vm1287_vm1, %v1135_v25 }
  0x3b   : > { %1185 = vmatpush3.bf16.xpose.msk.msra.mxu1 %vm1287_vm1, %v1183_v26  ;;  %1140 = vmatprep.subr.msk.bf16.mxu0 %vm1287_vm1, %v1138_v27 }
  0x3c   : > { %1188 = vmatprep.subr.msk.bf16.mxu1 %vm1287_vm1, %v1186_v28 }
  0x42   : > { %1143 = vmatpush3.bf16.xpose.msk.msra.mxu0 %vm1287_vm1, %v1141_v37  ;;  %v1025_v37 = vld [vmem:[%s1637_s6] ss:$0 sm:$0xff] }
  0x43   : > { %1191 = vmatpush3.bf16.xpose.msk.msra.mxu1 %vm1287_vm1, %v1189_v38  ;;  %1201 = vmatprep.subr.bf16.mxu0 %v1200_v40 }
  0x44   : > { %1193 = vmatprep.subr.bf16.mxu1 %v1192_v39 }
  0x49   : > { %1061 = vmatmul.mubr.msk.f32.vlgmr.msra.gmra.mrb[0].mxu0 %vm361_vm0, %v1408_v45 }
  0x4a   : > { %1095 = vmatmul.mubr.msk.f32.vlgmr.msra.gmra.mrb[0].mxu1 %vm361_vm0, %v1408_v45  ;;  %1203 = vmatpush1.bf16.xpose.msra.mxu0 %v1202_v50  ;;  %v717_v45 = vld [vmem:[%s1634_s3 + $0x70] sm:$0xff] }
  0x4b   : > { %1195 = vmatpush1.bf16.xpose.msra.mxu1 %v1194_v49  ;;  %1205 = vmatprep.subr.bf16.mxu0 %v1204_v52  ;;  %v1206_v57 = vpack.c.bf16 %v717_v45, %v713_v55 }
  0x4c   : > { %1197 = vmatprep.subr.bf16.mxu1 %v1196_v51 }
  0x52   : > { %1207 = vmatpush1.bf16.xpose.msra.mxu0 %v1206_v57 }
  0x53   : > { %1199 = vmatpush1.bf16.xpose.msra.mxu1 %v1198_v56 }
 0x11c   : > { %v623_v6 = vpop.f32.mrb[0].mxu0 }
 0x11d   : > { %v694_v7 = vpop.f32.mrb[0].mxu1  ;;  %v624_v8 = vadd.f32 %v623_v6, %v344_v1  ;;  %v625_v10 = vpop.f32.mrb[1].mxu0 }
 0x11e   : > { %v695_v9 = vadd.f32 %v694_v7, %v352_v2  ;;  %v696_v11 = vpop.f32.mrb[1].mxu1  ;;  %v626_v12 = vadd.f32 %v625_v10, %v348_v3 }
 0x11f   : > { %v697_v13 = vadd.f32 %v696_v11, %v356_v5  ;;  %v699_v17 = vmax.f32 %v624_v8, 0.0 }
 0x120   : > { %v701_v14 = vmax.f32 %v695_v9, 0.0  ;;  %v700_v15 = vmax.f32 %v626_v12, 0.0 }
 0x121   : > { %v702_v16 = vmax.f32 %v697_v13, 0.0 }
 0x122   : > { %790 = vmatprep.mubr.f32.mxu1 %v700_v15 }
 0x123   : > { %860 = vmatprep.mubr.f32.mxu0 %v702_v16  ;;  %791 = vmatmul.mubr.f32.vlgmr.msra.gmra.mrb[2].mxu1 %v699_v17 }
 0x124   : > { %861 = vmatmul.mubr.f32.vlgmr.msra.gmra.mrb[2].mxu0 %v701_v14 }
 0x1f6   : > { %v792_v19 = vpop.f32.mrb[2].mxu1 }
 0x1f7   : > { %v862_v20 = vpop.f32.mrb[2].mxu0  ;;  %v793_v21 = vadd.f32 %v1023_v18, %v792_v19  ;;  %v794_v22 = vpop.f32.mrb[3].mxu1 }
 0x1f8   : > { %v864_v23 = vpop.f32.mrb[3].mxu0 }
 0x1f9   : > { %v863_v24 = vadd.f32 %v862_v20, %v793_v21 }
 0x1fb   : > { %v866_v25 = vsel %vm361_vm0, %v863_v24, 0.0 }
 0x1fc   : > { %867 = vadd.xlane.f32.xlu0 %v866_v25 }
 0x289   : > { %v868_v26 = vpop.xlane.xlu0 %867 }
 0x28a   : > { %v870_v27 = vmul.f32 0.03125, %v868_v26 }
 0x28c   : > { %v871_v28 = vsub.f32 %v863_v24, %v870_v27 }
 0x28e   : > { %v872_v29 = vmul.f32 %v871_v28, %v871_v28 }
 0x290   : > { %v873_v30 = vsel %vm361_vm0, %v872_v29, 0.0 }
 0x291   : > { %874 = vadd.xlane.f32.xlu0 %v873_v30 }
 0x31e   : > { %v875_v31 = vpop.xlane.xlu0 %874 }
 0x31f   : > { %v876_v32 = vmul.f32 0.03125, %v875_v31 }
 0x321   : > { %v877_v33 = vadd.f32 1e-05, %v876_v32 }
 0x323   : > { %1218 = vrsqrt.f32 %v877_v33 }
 0x32d   : > { %v1219_v34 = vpop.eup %1218 }
 0x32e   : > { %v879_v36 = vmul.f32 %v1219_v34, %v871_v28 }
 0x330   : > { %v887_v38 = vmul.f32 %v1024_v35, %v879_v36 }
 0x332   : > { %v895_v39 = vadd.f32 %v1025_v37, %v887_v38 }
 0x334   : > { %896 = vst.msk [vmem:[%s273_s14] sm:$0xff] %vm361_vm0, %v895_v39 }
 0x335 PF: > { %s17_s24 = sadd.s32 1, %s1226_s24  }
 0x336   : > { %p14_p4 = scmp.ge.s32.totalorder %s17_s24, 4  }
 0x338   :  { %16 = sbr.rel (!%p14_p4) target bundleno = 1 (0x1), region = 78 }

// kernel: decoder_forward_pallas.13
= control target key start
LH: loop header
LB: loop body
LE: loop exit
PB: predicated region body
PF: predicated region fallthrough
CT: control target
= control target key end

     0   :  { %10 = vsyncpa [#allocation3], 0  ;;  %s820_s0 = inlined_call_operand.vmem [shape: f32[2,8,32], index: 0, kind: input, shape index: {}]   ;;  %s821_s1 = inlined_call_operand.vmem [shape: f32[32,32], index: 1, kind: input, shape index: {}]   ;;  %s822_s2 = inlined_call_operand.vmem [shape: f32[1,32], index: 2, kind: input, shape index: {}]   ;;  %s823_s3 = inlined_call_operand.vmem [shape: f32[16,32], index: 3, kind: input, shape index: {}]   ;;  %s824_s4 = inlined_call_operand.vmem [shape: f32[1,16], index: 4, kind: input, shape index: {}]   ;;  %s825_s5 = inlined_call_operand.hbm [shape: f32[2,8,16], index: 5, kind: output, shape index: {}]  }
   0x1   :  { %12 = vsyncpa [#allocation3 + $0x1], 0  ;;  %s682_s18 = smov 0   ;;  %s684_s19 = smov 0  }
   0x2   :  { %s686_s20 = smov 0   ;;  %s688_s21 = smov 0  }
   0x3 LB: > { %s703_s22 = sadd.s32 4294967295, %s646_s21   ;;  %s484_s23 = sadd.s32 4294967294, %s646_s21   ;;  %s646_s21 = sphi %s688_s21, %s833_s21   ;;  %s642_s20 = sphi %s686_s20, %s832_s20   ;;  %s638_s19 = sphi %s684_s19, %s831_s19   ;;  %s634_s18 = sphi %s682_s18, %s830_s18  }
   0x4   : > { %s707_s24 = sadd.s32 1, %s646_s21   ;;  %s135_s25 = sadd.s32 1, %s642_s20 }
   0x5   : > { %s132_s26 = ssub.s32 %s646_s21, %s707_s24  ;;  %p145_p0 = scmp.ne.s32.totalorder %s642_s20, %s638_s19 }
   0x6   : > { %p133_p1 = scmp.eq.s32.totalorder %s132_s26, 0  ;;  %p146_p2 = scmp.eq.s32.totalorder %s703_s22, 1 }
   0x7   : > { %p151_p3 = scmp.ne.s32.totalorder %s638_s19, %s634_s18  ;;  %p152_p4 = scmp.eq.s32.totalorder %s484_s23, 1 }
   0x8   : > { %s718_s27 = scalar_select %p133_p1, %s642_s20, %s135_s25  }
   0x9   : > { %p720_p5 = por %p146_p2, %p145_p0  ;;  %p724_p6 = por %p152_p4, %p151_p3 }
   0xa   : > { %p487_p7 = scmp.ge.s32.totalorder %s646_s21, 1  ;;  %p189_p8 = scmp.lt.s32.totalorder %s646_s21, 3 }
   0xc   : > { %p190_p9 = pnand %p487_p7, %p189_p8 }
   0xd   : > { %v221_v0 = vld [vmem:[%s821_s1] sm:$0xff] (!%p190_p9)  ;;  %v222_v1 = vld [vmem:[%s821_s1 + $0x8] sm:$0xff] (!%p190_p9)  ;;  %vm232_vm0 = vcmask (!%p190_p9), 261120   ;;  %v648_v2 = vmov (!%p190_p9), 0.0|0.0   ;;  %p216_p10 = scmp.lt.s32.totalorder (!%p190_p9), %s703_s22, 1  ;;  %vm649_vm2 = vmmov (!%p190_p9), 0  }
   0xe   : > { %193 = sbr.rel (%p190_p9) target bundleno = 476 (0x1dc), region = 40  ;;  %530 = vmatprep.subr.bf16.mxu0 (!%p190_p9), %v648_v2  ;;  %v531_v3 = vpack.c.bf16 (!%p190_p9), %v222_v1, %v221_v0  ;;  %vm738_vm1 = vmpackc.low (!%p190_p9), %vm232_vm0, %vm232_vm0  ;;  %538 = vmatprep.subr.bf16.mxu1 (!%p190_p9), %v648_v2  ;;  %v321_v5 = vld [vmem:[%s823_s3] sm:$0xff] (!%p190_p9)  ;;  %v650_v6 = vmov (!%p190_p9), 0.0   ;;  %v322_v7 = vld [vmem:[%s823_s3 + $0x8] sm:$0xff] (!%p190_p9)  ;;  %s213_s8 = sand.u32 (!%p190_p9), 1, %s638_s19   ;;  %vm409_vm4 = vcmask (!%p190_p9), 130048  }
   0xf   : > { %520 = vmatprep.mubr.msk.f32.mxu0 (!%p190_p9), %vm649_vm2, %v650_v6  ;;  %527 = vmatprep.mubr.msk.f32.mxu1 (!%p190_p9), %vm649_vm2, %v650_v6  ;;  %v539_v8 = vpack.c.bf16 (!%p190_p9), %v322_v7, %v321_v5  ;;  %v223_v9 = vld [vmem:[%s821_s1 + $0x10] sm:$0xff] (!%p190_p9)  ;;  %v224_v10 = vld [vmem:[%s821_s1 + $0x18] sm:$0xff] (!%p190_p9)  ;;  %v490_v13 = vld [vmem:[%s822_s2] ss:$0 sm:$0xff] (!%p190_p9)  ;;  %s488_s9 = sshll.u32 (!%p190_p9), %s213_s8, 3  ;;  %s501_s12 = sshll.u32 (!%p190_p9), %s703_s22, 7 }
  0x10   : > { %533 = vmatpush3.bf16.xpose.msk.msra.mxu0 (!%p190_p9), %vm738_vm1, %v531_v3  ;;  %v535_v11 = vpack.c.bf16 (!%p190_p9), %v224_v10, %v223_v9  ;;  %v496_v19 = vld [vmem:[%s824_s4] ss:$0 sm:$0xff] (!%p190_p9)  ;;  %s215_s13 = scalar_lea.vmem (!%p190_p9), [#allocation2], %s488_s9 }
  0x11   : > { %534 = vmatprep.subr.bf16.mxu0 (!%p190_p9), %v648_v2  ;;  %541 = vmatpush3.bf16.xpose.msk.msra.mxu1 (!%p190_p9), %vm738_vm1, %v539_v8  ;;  %s425_s14 = sshll.u32 (!%p190_p9), %s215_s13, 4  ;;  %s780_s14 = int_to_ptr.vmem [resolvable:$true] %s425_s14 }
  0x12   : > { %s584_s25 = scalar_lea.vmem (!%p190_p9), %s780_s14, 128 }
  0x13   : > { %p585_p11 = scmp.ne.s32.totalorder (!%p190_p9), %s780_s14, %s584_s25 }
  0x15   : > { %s217_s17 = scalar_select %p216_p10, %s703_s22, 1 }
  0x16   : > { %p586_p12 = pnand %p585_p11, %p720_p5  ;;  %s651_s22 = smov [#allocation2]  }
  0x17   : > { %s489_s23 = sshll.u32 %s217_s17, 3  ;;  %s778_s17 = scalar_lea.hbm %s825_s5, %s501_s12 }
  0x18   : > { %537 = vmatpush3.bf16.xpose.msk.msra.mxu0 %vm738_vm1, %v535_v11  ;;  %s219_s30 = scalar_lea.vmem %s820_s0, %s489_s23  ;;  %s412_s23 = scalar_lea.sflag [#allocation3], %s213_s8 }
  0x19   : > { %v220_v12 = vld [vmem:[%s219_s30] sm:$0xff]  ;;  %p587_p13 = pneg %p586_p12  ;;  %s588_s26 = sshll.u32 %s651_s22, 4  ;;  %s589_s26 = int_to_ptr.vmem [resolvable:$false] %s588_s26 }
  0x1a   : > { %s590_s30 = scalar_lea.vmem %s589_s26, 256  ;;  %p591_p0 = scmp.lt.s32.totalorder %s780_s14, %s589_s26 }
  0x1b   : > { %p592_p1 = scmp.lt.s32.totalorder %s590_s30, %s584_s25 }
  0x1d   : > { %p593_p2 = por %p592_p1, %p591_p0 }
  0x1f   : > { %521 = vmatmul.mubr.msk.f32.vlgmr.msra.gmra.mrb[0].mxu0 %vm232_vm0, %v220_v12  ;;  %p594_p3 = pnand %p593_p2, %p587_p13 }
  0xf2   : > { %v314_v14 = vpop.f32.mrb[0].mxu0 }
  0xf3   : > { %v315_v15 = vadd.f32 %v490_v13, %v314_v14  ;;  %v522_v16 = vpop.f32.mrb[1].mxu0 }
  0xf5   : > { %vm318_vm3 = vcmp.gt.f32.partialorder %v315_v15, 0.0  ;;  %v319_v17 = vmul.f32 0.01, %v315_v15 }
  0xf7   : > { %v320_v18 = vsel %vm318_vm3, %v315_v15, %v319_v17 }
  0xf8   : > { %528 = vmatmul.mubr.msk.f32.vlgmr.msra.gmra.mrb[0].mxu1 %vm232_vm0, %v320_v18 }
 0x1cb   : > { %v405_v20 = vpop.f32.mrb[0].mxu1 }
 0x1cc   : > { %v406_v21 = vadd.f32 %v496_v19, %v405_v20  ;;  %v529_v22 = vpop.f32.mrb[1].mxu1 }
 0x1ce   : > { %410 = vst.msk [vmem:[%s215_s13] sm:$0xff] %vm409_vm4, %v406_v21 }
 0x1cf   : > { %597 = shalt.err (!%p594_p3)
}
 0x1d0   : > { %s598_s6 = scalar_lea.hbm %s778_s17, 128  ;;  %s602_s9 = scalar_lea.hbm %s825_s5, 256 }
 0x1d1   : > { %p599_p4 = scmp.ne.s32.totalorder %s778_s17, %s598_s6  ;;  %p603_p9 = scmp.lt.u32.totalorder %s778_s17, %s825_s5 }
 0x1d2   : > { %p604_p10 = scmp.lt.u32.totalorder %s602_s9, %s598_s6  ;;  %p606_p12 = scmp.lt.u32.totalorder %s598_s6, %s778_s17 }
 0x1d3   : > { %p600_p7 = pnand %p599_p4, %p720_p5 }
 0x1d4   : > { %p605_p11 = por %p604_p10, %p603_p9 }
 0x1d5   : > { %p601_p8 = pneg %p600_p7 }
 0x1d6   : > { %p607_p13 = por %p606_p12, %p605_p11 }
 0x1d8   : > { %p608_p0 = pnand %p607_p13, %p601_p8 }
 0x1da   : > { %611 = shalt.err (!%p608_p0)
}
 0x1db   : > { %542 = dma.vmem_to_hbm [thread:$0]  (%p720_p5), %s780_s14, 128, %s778_s17, %s412_s23  }
 0x1dc PF: > { %p548_p1 = scmp.ge.s32.totalorder %s646_s21, 2  ;;  %s437_s12 = sand.u32 1, %s634_s18  }
 0x1dd   : > { %s438_s13 = scalar_lea.sflag [#allocation3], %s437_s12 }
 0x1de   : > { %p545_p2 = pnand %p548_p1, %p724_p6 }
 0x1e0   : > { %629 = dma.done.wait (!%p545_p2), %s438_s13, 128  }
 0x1e1   : > { %631 = vsyncadd (!%p545_p2), %s438_s13, 4294967168  ;;  %p15_p3 = scmp.ge.s32.totalorder %s707_s24, 4   ;;  %s830_s18 = smov %s638_s19 }
 0x1e2   : > { %s831_s19 = smov %s642_s20  ;;  %s832_s20 = smov %s718_s27 }
 0x1e3   : > { %s833_s21 = smov %s707_s24  ;;  %17 = sbr.rel (!%p15_p3) target bundleno = 3 (0x3), region = 75 }
 0x1ea   :  { %443 = vsyncpa [#allocation3], 1 }
 0x1eb   :  { %445 = vsyncpa [#allocation3 + $0x1], 1 }

// kernel: decoder_forward_pallas.8
= control target key start
LH: loop header
LB: loop body
LE: loop exit
PB: predicated region body
PF: predicated region fallthrough
CT: control target
= control target key end

     0   :  { %s2185_s27 = smov 0   ;;  %s2440_s0 = inlined_call_operand.vmem [shape: f32[2,8,32], index: 0, kind: input, shape index: {}]   ;;  %s2441_s1 = inlined_call_operand.vmem [shape: f32[2,12,32], index: 1, kind: input, shape index: {}]   ;;  %s2442_s2 = inlined_call_operand.vmem [shape: f32[32,32], index: 2, kind: input, shape index: {}]   ;;  %s2443_s3 = inlined_call_operand.vmem [shape: f32[1,32], index: 3, kind: input, shape index: {}]   ;;  %s2444_s4 = inlined_call_operand.vmem [shape: f32[64,32], index: 4, kind: input, shape index: {}]   ;;  %s2445_s5 = inlined_call_operand.vmem [shape: f32[1,64], index: 5, kind: input, shape index: {}]   ;;  %s2446_s6 = inlined_call_operand.vmem [shape: f32[32,32], index: 6, kind: input, shape index: {}]   ;;  %s2447_s7 = inlined_call_operand.vmem [shape: f32[1,32], index: 7, kind: input, shape index: {}]   ;;  %s2448_s8 = inlined_call_operand.vmem [shape: f32[2,8,32], index: 8, kind: output, shape index: {}]  }
   0x1 LB: > { %s1666_s28 = sadd.s32 4294967295, %s2127_s27   ;;  %p1670_p0 = scmp.ge.s32.totalorder %s2127_s27, 1  ;;  %s2127_s27 = sphi %s2185_s27, %s18_s27  }
   0x2   : > { %p271_p1 = scmp.lt.s32.totalorder %s2127_s27, 3 }
   0x4   : > { %p272_p2 = pnand %p1670_p0, %p271_p1 }
   0x5   : > { %vm335_vm0 = vcmask (!%p272_p2), 261120   ;;  %v421_v0 = vld [vmem:[%s2444_s4] sm:$0xff] (!%p272_p2)  ;;  %v422_v1 = vld [vmem:[%s2444_s4 + $0x8] sm:$0xff] (!%p272_p2)  ;;  %v423_v2 = vld [vmem:[%s2444_s4 + $0x10] sm:$0xff] (!%p272_p2)  ;;  %p308_p3 = scmp.lt.s32.totalorder (!%p272_p2), %s1666_s28, 1  ;;  %v2129_v6 = vmov (!%p272_p2), 0.0|0.0  }
   0x6   : > { %275 = sbr.rel (%p272_p2) target bundleno = 2507 (0x9cb), region = 52  ;;  %vm2204_vm1 = vmpackc.low (!%p272_p2), %vm335_vm0, %vm335_vm0  ;;  %v1933_v4 = vpack.c.bf16 (!%p272_p2), %v422_v1, %v421_v0  ;;  %v424_v5 = vld [vmem:[%s2444_s4 + $0x18] sm:$0xff] (!%p272_p2)  ;;  %1925 = vmatprep.subr.bf16.mxu0 (!%p272_p2), %v2129_v6  ;;  %v324_v8 = vld [vmem:[%s2442_s2] sm:$0xff] (!%p272_p2)  ;;  %vm2130_vm2 = vmmov (!%p272_p2), 0   ;;  %v2131_v10 = vmov (!%p272_p2), 0.0   ;;  %vm546_vm3 = vcmask (!%p272_p2), 64512  }
   0x7   : > { %v1939_v7 = vpack.c.bf16 (!%p272_p2), %v424_v5, %v423_v2  ;;  %v325_v9 = vld [vmem:[%s2442_s2 + $0x8] sm:$0xff] (!%p272_p2)  ;;  %1803 = vmatprep.mubr.msk.f32.mxu0 (!%p272_p2), %vm2130_vm2, %v2131_v10  ;;  %v425_v12 = vld [vmem:[%s2444_s4 + $0x20] sm:$0xff] (!%p272_p2)  ;;  %v326_v15 = vld [vmem:[%s2442_s2 + $0x10] sm:$0xff] (!%p272_p2)  ;;  %s2132_s23 = smov (!%p272_p2), 96   ;;  %s2133_s24 = smov (!%p272_p2), 120   ;;  %vm646_vm5 = vcmask (!%p272_p2), 1043456  }
   0x8   : > { %1935 = vmatprep.subr.msk.bf16.mxu1 (!%p272_p2), %vm2204_vm1, %v1933_v4  ;;  %v1926_v11 = vpack.c.bf16 (!%p272_p2), %v325_v9, %v324_v8  ;;  %v426_v13 = vld [vmem:[%s2444_s4 + $0x28] sm:$0xff] (!%p272_p2)  ;;  %v327_v16 = vld [vmem:[%s2442_s2 + $0x18] sm:$0xff] (!%p272_p2)  ;;  %v427_v19 = vld [vmem:[%s2444_s4 + $0x30] sm:$0xff] (!%p272_p2)  ;;  %vm2134_vm6 = vmmov (!%p272_p2), 1   ;;  %vm626_vm8 = vcmask (!%p272_p2), 97280   ;;  %s2135_s9 = smov (!%p272_p2), 88  }
   0x9   : > { %1938 = vmatpush3.bf16.xpose.msk.msra.mxu1 (!%p272_p2), %vm2204_vm1, %v1933_v4  ;;  %v1945_v17 = vpack.c.bf16 (!%p272_p2), %v426_v13, %v425_v12  ;;  %v1930_v18 = vpack.c.bf16 (!%p272_p2), %v327_v16, %v326_v15  ;;  %v428_v20 = vld [vmem:[%s2444_s4 + $0x38] sm:$0xff] (!%p272_p2)  ;;  %v1681_v26 = vld [vmem:[%s2445_s5] ss:$0 sm:$0xff] (!%p272_p2)  ;;  %vm2288_vm4 = vmpackc.low (!%p272_p2), %vm546_vm3, %vm546_vm3  ;;  %s2136_s10 = smov (!%p272_p2), 112   ;;  %s2137_s12 = smov (!%p272_p2), 104  }
   0xa   : > { %1941 = vmatprep.subr.msk.bf16.mxu1 (!%p272_p2), %vm2204_vm1, %v1939_v7  ;;  %1928 = vmatpush3.bf16.xpose.msk.msra.mxu0 (!%p272_p2), %vm2204_vm1, %v1926_v11  ;;  %v1951_v21 = vpack.c.bf16 (!%p272_p2), %v428_v20, %v427_v19  ;;  %v1675_v28 = vld [vmem:[%s2443_s3] ss:$0 sm:$0xff] (!%p272_p2)  ;;  %vm2303_vm7 = vmpackc.low (!%p272_p2), %vm646_vm5, %vm2134_vm6  ;;  %v543_v63 = vld [vmem:[%s2446_s6 + $0x10] sm:$0xff] (!%p272_p2)  ;;  %s2138_s17 = smov (!%p272_p2), 80  }
   0xb   : > { %1929 = vmatprep.subr.bf16.mxu0 (!%p272_p2), %v2129_v6  ;;  %v544_v0 = vld [vmem:[%s2446_s6 + $0x18] sm:$0xff] (!%p272_p2)  ;;  %v541_v13 = vld [vmem:[%s2446_s6] sm:$0xff] (!%p272_p2) }
   0xc   : > { %v2330_v1 = vpack.i.bf16 (!%p272_p2), %v544_v0, %v543_v63 }
   0xd   : > { %s2456_s28 = smov (!%p308_p3, %s1666_s28), 1 }
   0xe   : > { %s1735_s19 = sshll.u32 %s2456_s28, 4  ;;  %s1671_s11 = sshll.u32 %s2456_s28, 3 }
   0xf   : > { %s316_s26 = scalar_lea.vmem %s2441_s1, %s1735_s19  ;;  %s311_s18 = scalar_lea.vmem %s2440_s0, %s1671_s11 }
  0x10   : > { %v322_v14 = vld [vmem:[%s316_s26] sm:$0xff]  ;;  %v323_v23 = vld [vmem:[%s316_s26 + $0x8] sm:$0xf] }
  0x11   : > { %1822 = vmatprep.mubr.msk.f32.mxu1 %vm335_vm0, %v322_v14  ;;  %1944 = vmatpush3.bf16.xpose.msk.msra.mxu1 %vm2204_vm1, %v1939_v7  ;;  %v321_v22 = vld [vmem:[%s311_s18] sm:$0xff]  ;;  %v542_v14 = vld [vmem:[%s2446_s6 + $0x8] sm:$0xff]  ;;  %s2139_s18 = smov 72  }
  0x12   : > { %1947 = vmatprep.subr.msk.bf16.mxu1 %vm2204_vm1, %v1945_v17  ;;  %1932 = vmatpush3.bf16.xpose.msk.msra.mxu0 %vm2204_vm1, %v1930_v18  ;;  %v2350_v15 = vpack.i.bf16 %v542_v14, %v541_v13  ;;  %v1982_v18 = vpack.c.bf16 %v542_v14, %v541_v13 }
  0x13   : > { %1961 = vmatprep.subr.bf16.mxu0 %v2129_v6 }
  0x19   : > { %1950 = vmatpush3.bf16.xpose.msk.msra.mxu1 %vm2204_vm1, %v1945_v17  ;;  %1804 = vmatmul.mubr.msk.f32.vlgmr.msra.gmra.mrb[0].mxu0 %vm335_vm0, %v321_v22 }
  0x1a   : > { %1953 = vmatprep.subr.msk.bf16.mxu1 %vm2204_vm1, %v1951_v21  ;;  %1836 = vmatprep.mubr.msk.f32.mxu0 %vm2130_vm2, %v2131_v10 }
  0x21   : > { %1956 = vmatpush3.bf16.xpose.msk.msra.mxu1 %vm2204_vm1, %v1951_v21  ;;  %v1986_v21 = vpack.c.bf16 %v544_v0, %v543_v63 }
  0x22   : > { %1957 = vmatprep.subr.bf16.mxu1 %v2129_v6 }
  0x28   : > { %1823 = vmatmul.mubr.msk.f32.vlgmr.msra.gmra.mrb[0].mxu1 %vm335_vm0, %v323_v23 }
  0x29   : > { %1829 = vmatprep.mubr.msk.f32.mxu1 %vm2130_vm2, %v2131_v10 }
  0xec   : > { %v417_v24 = vpop.f32.mrb[0].mxu0 }
  0xed   : > { %v1805_v25 = vpop.f32.mrb[1].mxu0  ;;  %v418_v33 = vadd.f32 %v1675_v28, %v417_v24 }
  0xef   : > { %v545_v36 = vmul.f32 0.35355338, %v418_v33 }
  0xfb   : > { %v1824_v27 = vpop.f32.mrb[0].mxu1 }
  0xfc   : > { %v538_v29 = vadd.f32 %v1824_v27, %v1681_v26  ;;  %v532_v30 = vpop.f32.mrb[1].mxu1 }
  0xfd   : > { %v533_v31 = vadd.f32 %v1681_v26, %v532_v30 }
  0xff   : > { %v2292_v34 = vpack.i.bf16 %v538_v29, %v533_v31  ;;  %v1958_v35 = vpack.c.bf16 %v538_v29, %v533_v31 }
 0x101   : > { %2041 = vrot.lane.b32.xlu1 %v2292_v34, %s2132_s23  ;;  %1960 = vmatpush3.bf16.xpose.msk.msra.mxu1 %vm2288_vm4, %v1958_v35  ;;  %s320_s23 = scalar_lea.vmem %s2448_s8, %s1671_s11 }
 0x102   : > { %1969 = vmatprep.subr.bf16.mxu1 %v2129_v6 }
 0x105   : > { %2046 = vrot.lane.b32.xlu1 %v2292_v34, %s2133_s24 }
 0x108   : > { %1830 = vmatmul.mubr.msk.f32.vlgmr.msra.gmra.mrb[2].mxu1 %vm546_vm3, %v545_v36 }
 0x109   : > { %1850 = vmatprep.mubr.msk.f32.mxu1 %vm2130_vm2, %v2131_v10 }
 0x173   : > { %v2042_v37 = vpop.permute.xlu1 %2041 }
 0x174   : > { %v2044_v38 = vunpack.i.h.bf16 %v2042_v37  ;;  %v2043_v39 = vunpack.i.l.bf16 %v2042_v37 }
 0x176   : > { %v1962_v41 = vpack.c.bf16 %v2044_v38, %v2043_v39 }
 0x177   : > { %v2047_v51 = vpop.permute.xlu1 %2046 }
 0x178   : > { %1964 = vmatpush3.bf16.msk.msra.mxu0 %vm2303_vm7, %v1962_v41  ;;  %v2049_v52 = vunpack.i.h.bf16 %v2047_v51  ;;  %v2048_v53 = vunpack.i.l.bf16 %v2047_v51 }
 0x179   : > { %1965 = vmatprep.subr.bf16.mxu0 %v2129_v6 }
 0x17a   : > { %v1966_v56 = vpack.c.bf16 %v2049_v52, %v2048_v53 }
 0x1db   : > { %v622_v42 = vpop.f32.mrb[2].mxu1 }
 0x1dc   : > { %v1831_v43 = vpop.f32.mrb[3].mxu1  ;;  %v627_v44 = vsel %vm626_vm8, %v622_v42, -inf }
 0x1dd   : > { %628 = vmax.xlane.f32.xlu0 %v627_v44 }
 0x26a   : > { %v629_v45 = vpop.xlane.xlu0 %628 }
 0x26b   : > { %v630_v46 = vsub.f32 %v622_v42, %v629_v45 }
 0x26d   : > { %v631_v47 = vmul.f32 1.442695, %v630_v46 }
 0x26f   : > { %2105 = vpow2.f32 %v631_v47 }
 0x279   : > { %v2106_v48 = vpop.eup %2105 }
 0x27a   : > { %v633_v49 = vsel %vm626_vm8, %v2106_v48, 0.0 }
 0x27b   : > { %634 = vadd.xlane.f32.xlu0 %v633_v49 }
 0x291   : > { %719 = vrot.lane.b32.xlu0 %v545_v36, %s2133_s24 }
 0x308   : > { %v635_v50 = vpop.xlane.xlu0 %634 }
 0x309   : > { %2107 = vrcp.f32 %v635_v50 }
 0x30c   : > { %v720_v57 = vpop.permute.xlu0 %719 }
 0x313   : > { %v2108_v54 = vpop.eup %2107 }
 0x314   : > { %v637_v55 = vmul.f32 %v2108_v54, %v2106_v48 }
 0x316   : > { %1837 = vmatmul.mubr.msk.f32.vlgmr.msra.gmra.mrb[2].mxu0 %vm626_vm8, %v637_v55 }
 0x317   : > { %1968 = vmatpush3.bf16.xpose.msk.msra.mxu0 %vm2288_vm4, %v1966_v56  ;;  %1843 = vmatprep.mubr.msk.f32.mxu0 %vm2130_vm2, %v2131_v10 }
 0x318   : > { %1973 = vmatprep.subr.bf16.mxu0 %v2129_v6 }
 0x31e   : > { %1844 = vmatmul.mubr.msk.f32.vlgmr.msra.gmra.mrb[4].mxu0 %vm546_vm3, %v720_v57 }
 0x31f   : > { %1861 = vmatprep.mubr.msk.f32.mxu0 %vm2130_vm2, %v2131_v10 }
 0x3e9   : > { %v715_v58 = vpop.f32.mrb[2].mxu0 }
 0x3ea   : > { %v1838_v59 = vpop.f32.mrb[3].mxu0 }
 0x3f1   : > { %v797_v60 = vpop.f32.mrb[4].mxu0 }
 0x3f2   : > { %v1845_v61 = vpop.f32.mrb[5].mxu0  ;;  %v801_v62 = vsel %vm626_vm8, %v797_v60, -inf }
 0x3f3   : > { %802 = vmax.xlane.f32.xlu1 %v801_v62 }
 0x404   : > { %2051 = vrot.lane.b32.xlu1 %v2292_v34, %s2135_s9 }
 0x408   : > { %2061 = vrot.lane.b32.xlu1 %v2330_v1, %s2133_s24 }
 0x40c   : > { %2066 = vrot.lane.b32.xlu1 %v2292_v34, %s2136_s10 }
 0x410   : > { %2071 = vrot.lane.b32.xlu1 %v2292_v34, %s2137_s12 }
 0x414   : > { %1066 = vrot.lane.b32.xlu1 %v545_v36, %s2136_s10 }
 0x418   : > { %1329 = vrot.lane.b32.xlu1 %v545_v36, %s2137_s12 }
 0x480   : > { %v803_v2 = vpop.xlane.xlu1 %802 }
 0x481   : > { %v804_v3 = vsub.f32 %v797_v60, %v803_v2 }
 0x483   : > { %v805_v4 = vmul.f32 1.442695, %v804_v3 }
 0x484   : > { %v2052_v5 = vpop.permute.xlu1 %2051 }
 0x485   : > { %2109 = vpow2.f32 %v805_v4  ;;  %v2054_v7 = vunpack.i.h.bf16 %v2052_v5  ;;  %v2053_v8 = vunpack.i.l.bf16 %v2052_v5 }
 0x487   : > { %v1970_v9 = vpack.c.bf16 %v2054_v7, %v2053_v8 }
 0x488   : > { %v2062_v25 = vpop.permute.xlu1 %2061 }
 0x489   : > { %1972 = vmatpush3.bf16.msk.msra.mxu1 %vm2303_vm7, %v1970_v9  ;;  %v2064_v26 = vunpack.i.h.bf16 %v2062_v25  ;;  %v2063_v27 = vunpack.i.l.bf16 %v2062_v25 }
 0x48a   : > { %1981 = vmatprep.subr.bf16.mxu1 %v2129_v6 }
 0x48b   : > { %v1978_v28 = vpack.c.bf16 %v2064_v26, %v2063_v27 }
 0x48c   : > { %v2067_v29 = vpop.permute.xlu1 %2066 }
 0x48d   : > { %v2069_v30 = vunpack.i.h.bf16 %v2067_v29  ;;  %v2068_v31 = vunpack.i.l.bf16 %v2067_v29 }
 0x48f   : > { %v2110_v11 = vpop.eup %2109  ;;  %v1990_v33 = vpack.c.bf16 %v2069_v30, %v2068_v31 }
 0x490   : > { %v807_v12 = vsel %vm626_vm8, %v2110_v11, 0.0  ;;  %v2072_v36 = vpop.permute.xlu1 %2071 }
 0x491   : > { %808 = vadd.xlane.f32.xlu0 %v807_v12  ;;  %v2074_v38 = vunpack.i.h.bf16 %v2072_v36  ;;  %v2073_v39 = vunpack.i.l.bf16 %v2072_v36 }
 0x493   : > { %v2006_v41 = vpack.c.bf16 %v2074_v38, %v2073_v39  ;;  %v1732_v39 = vld [vmem:[%s2447_s7] ss:$0 sm:$0xff] }
 0x494   : > { %v1067_v42 = vpop.permute.xlu1 %1066 }
 0x498   : > { %v1330_v43 = vpop.permute.xlu1 %1329 }
 0x4a7   : > { %2056 = vrot.lane.b32.xlu0 %v2350_v15, %s2133_s24 }
 0x51e   : > { %v809_v16 = vpop.xlane.xlu0 %808 }
 0x51f   : > { %2111 = vrcp.f32 %v809_v16 }
 0x522   : > { %v2057_v20 = vpop.permute.xlu0 %2056 }
 0x523   : > { %v2059_v22 = vunpack.i.h.bf16 %v2057_v20  ;;  %v2058_v23 = vunpack.i.l.bf16 %v2057_v20 }
 0x525   : > { %v1974_v24 = vpack.c.bf16 %v2059_v22, %v2058_v23 }
 0x527   : > { %1976 = vmatpush3.bf16.xpose.msk.msra.mxu0 %vm2288_vm4, %v1974_v24 }
 0x528   : > { %1977 = vmatprep.subr.bf16.mxu0 %v2129_v6 }
 0x529   : > { %v2112_v17 = vpop.eup %2111 }
 0x52a   : > { %v811_v19 = vmul.f32 %v2112_v17, %v2110_v11 }
 0x52c   : > { %1851 = vmatmul.mubr.msk.f32.vlgmr.msra.gmra.mrb[4].mxu1 %vm626_vm8, %v811_v19 }
 0x52d   : > { %1984 = vmatpush3.bf16.xpose.msk.msra.mxu1 %vm2288_vm4, %v1982_v18  ;;  %1872 = vmatprep.mubr.msk.f32.mxu1 %vm2130_vm2, %v2131_v10 }
 0x52e   : > { %1985 = vmatprep.subr.bf16.mxu1 %v2129_v6 }
 0x52f   : > { %1980 = vmatpush3.bf16.xpose.msk.msra.mxu0 %vm2288_vm4, %v1978_v28 }
 0x530   : > { %1989 = vmatprep.subr.bf16.mxu0 %v2129_v6 }
 0x535   : > { %1988 = vmatpush3.bf16.xpose.msk.msra.mxu1 %vm2288_vm4, %v1986_v21 }
 0x536   : > { %1993 = vmatprep.subr.bf16.mxu1 %v2129_v6 }
 0x53c   : > { %1873 = vmatmul.mubr.msk.f32.vlgmr.msra.gmra.mrb[6].mxu1 %vm546_vm3, %v715_v58 }
 0x53d   : > { %1886 = vmatprep.mubr.msk.f32.mxu1 %vm2130_vm2, %v2131_v10 }
 0x5ff   : > { %v888_v35 = vpop.f32.mrb[4].mxu1 }
 0x600   : > { %v1852_v37 = vpop.f32.mrb[5].mxu1  ;;  %1862 = vmatmul.mubr.msk.f32.vlgmr.msra.gmra.mrb[6].mxu0 %vm546_vm3, %v888_v35 }
 0x601   : > { %1992 = vmatpush3.bf16.xpose.msk.msra.mxu0 %vm2288_vm4, %v1990_v33  ;;  %1879 = vmatprep.mubr.msk.f32.mxu0 %vm2130_vm2, %v2131_v10 }
 0x602   : > { %2005 = vmatprep.subr.bf16.mxu0 %v2129_v6 }
 0x608   : > { %1880 = vmatmul.mubr.msk.f32.vlgmr.msra.gmra.mrb[8].mxu0 %vm546_vm3, %v1067_v42 }
 0x609   : > { %2008 = vmatpush3.bf16.xpose.msk.msra.mxu0 %vm2288_vm4, %v2006_v41  ;;  %1904 = vmatprep.mubr.msk.f32.mxu0 %vm2130_vm2, %v2131_v10 }
 0x60a   : > { %2009 = vmatprep.subr.bf16.mxu0 %v2129_v6 }
 0x60f   : > { %v1062_v44 = vpop.f32.mrb[6].mxu1 }
 0x610   : > { %v1874_v45 = vpop.f32.mrb[7].mxu1  ;;  %1905 = vmatmul.mubr.msk.f32.vlgmr.msra.gmra.mrb[10].mxu0 %vm546_vm3, %v1330_v43 }
 0x611   : > { %1911 = vmatprep.mubr.msk.f32.mxu0 %vm2130_vm2, %v2131_v10 }
 0x6d3   : > { %v981_v46 = vpop.f32.mrb[6].mxu0 }
 0x6d4   : > { %v2387_v47 = vadd.f32 %v1062_v44, %v981_v46  ;;  %v1863_v48 = vpop.f32.mrb[7].mxu0 }
 0x6db   : > { %v1144_v49 = vpop.f32.mrb[8].mxu0 }
 0x6dc   : > { %v1881_v50 = vpop.f32.mrb[9].mxu0  ;;  %v1148_v51 = vsel %vm626_vm8, %v1144_v49, -inf }
 0x6dd   : > { %1149 = vmax.xlane.f32.xlu1 %v1148_v51 }
 0x6e3   : > { %v1407_v52 = vpop.f32.mrb[10].mxu0 }
 0x6e4   : > { %v1906_v53 = vpop.f32.mrb[11].mxu0  ;;  %v1411_v54 = vsel %vm626_vm8, %v1407_v52, -inf }
 0x6e5   : > { %1412 = vmax.xlane.f32.xlu0 %v1411_v54 }
 0x76a   : > { %v1150_v55 = vpop.xlane.xlu1 %1149 }
 0x76b   : > { %v1151_v56 = vsub.f32 %v1144_v49, %v1150_v55 }
 0x76d   : > { %v1152_v57 = vmul.f32 1.442695, %v1151_v56 }
 0x76f   : > { %2113 = vpow2.f32 %v1152_v57 }
 0x772   : > { %v1413_v58 = vpop.xlane.xlu0 %1412 }
 0x773   : > { %v1414_v59 = vsub.f32 %v1407_v52, %v1413_v58 }
 0x775   : > { %v1415_v60 = vmul.f32 1.442695, %v1414_v59 }
 0x777   : > { %2115 = vpow2.f32 %v1415_v60 }
 0x779   : > { %v2114_v61 = vpop.eup %2113 }
 0x77a   : > { %v1154_v62 = vsel %vm626_vm8, %v2114_v61, 0.0 }
 0x77b   : > { %1155 = vadd.xlane.f32.xlu0 %v1154_v62 }
 0x781   : > { %v2116_v63 = vpop.eup %2115 }
 0x782   : > { %v1417_v0 = vsel %vm626_vm8, %v2116_v63, 0.0 }
 0x783   : > { %1418 = vadd.xlane.f32.xlu1 %v1417_v0 }
 0x791   : > { %2076 = vrot.lane.b32.xlu0 %v2292_v34, %s2138_s17 }
 0x794   : > { %2081 = vrot.lane.b32.xlu1 %v2292_v34, %s2139_s18 }
 0x795   : > { %2091 = vrot.lane.b32.xlu0 %v2350_v15, %s2137_s12 }
 0x798   : > { %2086 = vrot.lane.b32.xlu1 %v2350_v15, %s2136_s10 }
 0x799   : > { %2101 = vrot.lane.b32.xlu0 %v2330_v1, %s2137_s12 }
 0x79c   : > { %2096 = vrot.lane.b32.xlu1 %v2330_v1, %s2136_s10 }
 0x808   : > { %v1156_v2 = vpop.xlane.xlu0 %1155 }
 0x809   : > { %2117 = vrcp.f32 %v1156_v2 }
 0x80c   : > { %v2077_v3 = vpop.permute.xlu0 %2076 }
 0x80d   : > { %v2079_v4 = vunpack.i.h.bf16 %v2077_v3  ;;  %v2078_v5 = vunpack.i.l.bf16 %v2077_v3 }
 0x80f   : > { %v1994_v7 = vpack.c.bf16 %v2079_v4, %v2078_v5 }
 0x810   : > { %v1419_v8 = vpop.xlane.xlu1 %1418  ;;  %v2092_v14 = vpop.permute.xlu0 %2091 }
 0x811   : > { %2119 = vrcp.f32 %v1419_v8  ;;  %1996 = vmatpush3.bf16.msk.msra.mxu1 %vm2303_vm7, %v1994_v7  ;;  %v2094_v18 = vunpack.i.h.bf16 %v2092_v14  ;;  %v2093_v19 = vunpack.i.l.bf16 %v2092_v14 }
 0x812   : > { %1997 = vmatprep.subr.bf16.mxu1 %v2129_v6 }
 0x813   : > { %v2118_v34 = vpop.eup %2117  ;;  %v2014_v26 = vpack.c.bf16 %v2094_v18, %v2093_v19 }
 0x814   : > { %v1158_v9 = vmul.f32 %v2118_v34, %v2114_v61  ;;  %v2082_v11 = vpop.permute.xlu1 %2081  ;;  %v2102_v40 = vpop.permute.xlu0 %2101 }
 0x815   : > { %v2084_v12 = vunpack.i.h.bf16 %v2082_v11  ;;  %v2083_v13 = vunpack.i.l.bf16 %v2082_v11  ;;  %v2104_v28 = vunpack.i.h.bf16 %v2102_v40  ;;  %v2103_v29 = vunpack.i.l.bf16 %v2102_v40 }
 0x816   : > { %1887 = vmatmul.mubr.msk.f32.vlgmr.msra.gmra.mrb[8].mxu1 %vm626_vm8, %v1158_v9 }
 0x817   : > { %v2010_v1 = vpack.c.bf16 %v2084_v12, %v2083_v13  ;;  %1897 = vmatprep.mubr.msk.f32.mxu1 %vm2130_vm2, %v2131_v10  ;;  %v2018_v30 = vpack.c.bf16 %v2104_v28, %v2103_v29 }
 0x818   : > { %v2087_v15 = vpop.permute.xlu1 %2086 }
 0x819   : > { %2012 = vmatpush3.bf16.msk.msra.mxu0 %vm2303_vm7, %v2010_v1  ;;  %v2089_v16 = vunpack.i.h.bf16 %v2087_v15  ;;  %v2088_v17 = vunpack.i.l.bf16 %v2087_v15 }
 0x81a   : > { %2013 = vmatprep.subr.bf16.mxu0 %v2129_v6 }
 0x81b   : > { %v2120_v20 = vpop.eup %2119  ;;  %v1998_v21 = vpack.c.bf16 %v2089_v16, %v2088_v17 }
 0x81c   : > { %v1421_v22 = vmul.f32 %v2120_v20, %v2116_v63  ;;  %v2097_v23 = vpop.permute.xlu1 %2096 }
 0x81d   : > { %2000 = vmatpush3.bf16.xpose.msk.msra.mxu1 %vm2288_vm4, %v1998_v21  ;;  %v2099_v24 = vunpack.i.h.bf16 %v2097_v23  ;;  %v2098_v25 = vunpack.i.l.bf16 %v2097_v23 }
 0x81e   : > { %1912 = vmatmul.mubr.msk.f32.vlgmr.msra.gmra.mrb[12].mxu0 %vm626_vm8, %v1421_v22  ;;  %2001 = vmatprep.subr.bf16.mxu1 %v2129_v6 }
 0x81f   : > { %1922 = vmatprep.mubr.msk.f32.mxu0 %vm2130_vm2, %v2131_v10  ;;  %v2002_v27 = vpack.c.bf16 %v2099_v24, %v2098_v25 }
 0x822   : > { %2016 = vmatpush3.bf16.xpose.msk.msra.mxu0 %vm2288_vm4, %v2014_v26 }
 0x823   : > { %2017 = vmatprep.subr.bf16.mxu0 %v2129_v6 }
 0x825   : > { %2004 = vmatpush3.bf16.xpose.msk.msra.mxu1 %vm2288_vm4, %v2002_v27 }
 0x82a   : > { %2020 = vmatpush3.bf16.xpose.msk.msra.mxu0 %vm2288_vm4, %v2018_v30 }
 0x8e9   : > { %v1235_v31 = vpop.f32.mrb[8].mxu1 }
 0x8ea   : > { %v1888_v33 = vpop.f32.mrb[9].mxu1  ;;  %1898 = vmatmul.mubr.msk.f32.vlgmr.msra.gmra.mrb[10].mxu1 %vm546_vm3, %v1235_v31 }
 0x8f1   : > { %v1498_v10 = vpop.f32.mrb[12].mxu0 }
 0x8f2   : > { %v1913_v35 = vpop.f32.mrb[13].mxu0  ;;  %1923 = vmatmul.mubr.msk.f32.vlgmr.msra.gmra.mrb[14].mxu0 %vm546_vm3, %v1498_v10 }
 0x9bd   : > { %v1324_v36 = vpop.f32.mrb[10].mxu1 }
 0x9be   : > { %v1328_v37 = vadd.f32 %v1324_v36, %v2387_v47  ;;  %v1899_v6 = vpop.f32.mrb[11].mxu1 }
 0x9c5   : > { %v1587_v38 = vpop.f32.mrb[14].mxu0 }
 0x9c6   : > { %v1591_v41 = vadd.f32 %v1587_v38, %v1328_v37  ;;  %v1924_v32 = vpop.f32.mrb[15].mxu0 }
 0x9c8   : > { %v1599_v42 = vadd.f32 %v1732_v39, %v1591_v41 }
 0x9ca   : > { %1600 = vst.msk [vmem:[%s320_s23] sm:$0xff] %vm335_vm0, %v1599_v42 }
 0x9cb PF: > { %s18_s27 = sadd.s32 1, %s2127_s27  }
 0x9cc   : > { %p15_p4 = scmp.ge.s32.totalorder %s18_s27, 4  }
 0x9ce   :  { %17 = sbr.rel (!%p15_p4) target bundleno = 1 (0x1), region = 85 }

// kernel: decoder_forward_pallas.7
= control target key start
LH: loop header
LB: loop body
LE: loop exit
PB: predicated region body
PF: predicated region fallthrough
CT: control target
= control target key end

     0   :  { %s2027_s27 = smov 0   ;;  %s2271_s0 = inlined_call_operand.vmem [shape: f32[2,8,32], index: 0, kind: input, shape index: {}, may-alias: {0,1}]   ;;  %s2272_s1 = inlined_call_operand.vmem [shape: f32[2,8,32], index: 1, kind: input, shape index: {}, may-alias: {0,1}]   ;;  %s2273_s2 = inlined_call_operand.vmem [shape: f32[32,32], index: 2, kind: input, shape index: {}]   ;;  %s2274_s3 = inlined_call_operand.vmem [shape: f32[1,32], index: 3, kind: input, shape index: {}]   ;;  %s2275_s4 = inlined_call_operand.vmem [shape: f32[64,32], index: 4, kind: input, shape index: {}]   ;;  %s2276_s5 = inlined_call_operand.vmem [shape: f32[1,64], index: 5, kind: input, shape index: {}]   ;;  %s2277_s6 = inlined_call_operand.vmem [shape: f32[32,32], index: 6, kind: input, shape index: {}]   ;;  %s2278_s7 = inlined_call_operand.vmem [shape: f32[1,32], index: 7, kind: input, shape index: {}]   ;;  %s2279_s8 = inlined_call_operand.vmem [shape: f32[2,8,32], index: 8, kind: output, shape index: {}]  }
   0x1 LB: > { %s1621_s28 = sadd.s32 4294967295, %s1970_s27   ;;  %p1625_p0 = scmp.ge.s32.totalorder %s1970_s27, 1  ;;  %s1970_s27 = sphi %s2027_s27, %s18_s27  }
   0x2   : > { %p270_p1 = scmp.lt.s32.totalorder %s1970_s27, 3 }
   0x4   : > { %p271_p2 = pnand %p1625_p0, %p270_p1 }
   0x5   : > { %vm331_vm0 = vcmask (!%p271_p2), 261120   ;;  %v417_v0 = vld [vmem:[%s2275_s4] sm:$0xff] (!%p271_p2)  ;;  %v418_v1 = vld [vmem:[%s2275_s4 + $0x8] sm:$0xff] (!%p271_p2)  ;;  %v1972_v2 = vmov (!%p271_p2), 0.0|0.0   ;;  %vm1973_vm2 = vmmov (!%p271_p2), 0   ;;  %v1974_v7 = vmov (!%p271_p2), 0.0  }
   0x6   : > { %274 = sbr.rel (%p271_p2) target bundleno = 2485 (0x9b5), region = 52  ;;  %1852 = vmatprep.subr.bf16.mxu1 (!%p271_p2), %v1972_v2  ;;  %vm2044_vm1 = vmpackc.low (!%p271_p2), %vm331_vm0, %vm331_vm0  ;;  %v1853_v4 = vpack.c.bf16 (!%p271_p2), %v418_v1, %v417_v0  ;;  %1844 = vmatprep.subr.bf16.mxu0 (!%p271_p2), %v1972_v2  ;;  %v320_v5 = vld [vmem:[%s2273_s2] sm:$0xff] (!%p271_p2)  ;;  %v321_v6 = vld [vmem:[%s2273_s2 + $0x8] sm:$0xff] (!%p271_p2)  ;;  %p306_p3 = scmp.lt.s32.totalorder (!%p271_p2), %s1621_s28, 1  ;;  %vm534_vm3 = vcmask (!%p271_p2), 64512  }
   0x7   : > { %1757 = vmatprep.mubr.msk.f32.mxu1 (!%p271_p2), %vm1973_vm2, %v1974_v7  ;;  %1738 = vmatprep.mubr.msk.f32.mxu0 (!%p271_p2), %vm1973_vm2, %v1974_v7  ;;  %v1845_v8 = vpack.c.bf16 (!%p271_p2), %v321_v6, %v320_v5  ;;  %v419_v9 = vld [vmem:[%s2275_s4 + $0x10] sm:$0xff] (!%p271_p2)  ;;  %v420_v10 = vld [vmem:[%s2275_s4 + $0x18] sm:$0xff] (!%p271_p2)  ;;  %v421_v15 = vld [vmem:[%s2275_s4 + $0x20] sm:$0xff] (!%p271_p2)  ;;  %s1975_s21 = smov (!%p271_p2), 96   ;;  %s1976_s22 = smov (!%p271_p2), 120  }
   0x8   : > { %1855 = vmatpush3.bf16.xpose.msk.msra.mxu1 (!%p271_p2), %vm2044_vm1, %v1853_v4  ;;  %v322_v11 = vld [vmem:[%s2273_s2 + $0x10] sm:$0xff] (!%p271_p2)  ;;  %v323_v12 = vld [vmem:[%s2273_s2 + $0x18] sm:$0xff] (!%p271_p2)  ;;  %v1857_v13 = vpack.c.bf16 (!%p271_p2), %v420_v10, %v419_v9  ;;  %v422_v16 = vld [vmem:[%s2275_s4 + $0x28] sm:$0xff] (!%p271_p2)  ;;  %s1977_s11 = smov (!%p271_p2), 88   ;;  %s1978_s12 = smov (!%p271_p2), 112  }
   0x9   : > { %1856 = vmatprep.subr.bf16.mxu1 (!%p271_p2), %v1972_v2  ;;  %1847 = vmatpush3.bf16.xpose.msk.msra.mxu0 (!%p271_p2), %vm2044_vm1, %v1845_v8  ;;  %v1849_v14 = vpack.c.bf16 (!%p271_p2), %v323_v12, %v322_v11  ;;  %v1861_v17 = vpack.c.bf16 (!%p271_p2), %v422_v16, %v421_v15  ;;  %v423_v19 = vld [vmem:[%s2275_s4 + $0x30] sm:$0xff] (!%p271_p2)  ;;  %v424_v20 = vld [vmem:[%s2275_s4 + $0x38] sm:$0xff] (!%p271_p2)  ;;  %v1629_v25 = vld [vmem:[%s2274_s3] ss:$0 sm:$0xff] (!%p271_p2)  ;;  %s1979_s13 = smov (!%p271_p2), 104   ;;  %s1980_s14 = smov (!%p271_p2), 72  }
   0xa   : > { %1848 = vmatprep.subr.bf16.mxu0 (!%p271_p2), %v1972_v2  ;;  %v1865_v21 = vpack.c.bf16 (!%p271_p2), %v424_v20, %v423_v19  ;;  %v1635_v26 = vld [vmem:[%s2276_s5] ss:$0 sm:$0xff] (!%p271_p2)  ;;  %v530_v42 = vld [vmem:[%s2277_s6 + $0x8] sm:$0xff] (!%p271_p2)  ;;  %vm2154_vm4 = vmpackc.low (!%p271_p2), %vm534_vm3, %vm534_vm3  ;;  %s1981_s15 = smov (!%p271_p2), 80  }
   0xb   : > { %v529_v41 = vld [vmem:[%s2277_s6] sm:$0xff] (!%p271_p2)  ;;  %v531_v45 = vld [vmem:[%s2277_s6 + $0x10] sm:$0xff] (!%p271_p2)  ;;  %v532_v46 = vld [vmem:[%s2277_s6 + $0x18] sm:$0xff] (!%p271_p2) }
   0xc   : > { %v1877_v44 = vpack.c.bf16 (!%p271_p2), %v530_v42, %v529_v41  ;;  %v1881_v47 = vpack.c.bf16 (!%p271_p2), %v532_v46, %v531_v45  ;;  %v2183_v58 = vpack.i.bf16 (!%p271_p2), %v532_v46, %v531_v45  ;;  %v2202_v8 = vpack.i.bf16 (!%p271_p2), %v530_v42, %v529_v41 }
   0xd   : > { %s2285_s28 = smov (!%p306_p3, %s1621_s28), 1 }
   0xe   : > { %s2083_s23 = sshll.u32 %s2285_s28, 3 }
   0xf   : > { %s309_s28 = scalar_lea.vmem %s2271_s0, %s2083_s23  ;;  %s313_s16 = scalar_lea.vmem %s2272_s1, %s2083_s23 }
  0x10   : > { %1859 = vmatpush3.bf16.xpose.msk.msra.mxu1 %vm2044_vm1, %v1857_v13  ;;  %v318_v18 = vld [vmem:[%s309_s28] sm:$0xff]  ;;  %s317_s20 = scalar_lea.vmem %s2279_s8, %s2083_s23 }
  0x11   : > { %1860 = vmatprep.subr.bf16.mxu1 %v1972_v2  ;;  %1851 = vmatpush3.bf16.xpose.msk.msra.mxu0 %vm2044_vm1, %v1849_v14  ;;  %v319_v22 = vld [vmem:[%s313_s16] sm:$0xff] }
  0x12   : > { %1760 = vmatprep.subr.mxu0 %v1974_v7 }
  0x18   : > { %1863 = vmatpush3.bf16.xpose.msk.msra.mxu1 %vm2044_vm1, %v1861_v17  ;;  %1739 = vmatmul.mubr.msk.f32.vlgmr.msra.gmra.mrb[0].mxu0 %vm331_vm0, %v318_v18 }
  0x19   : > { %1864 = vmatprep.subr.bf16.mxu1 %v1972_v2  ;;  %1762 = vmatprep.mubr.msk.f32.mxu0 %vm1973_vm2, %v1974_v7 }
  0x20   : > { %1867 = vmatpush3.bf16.xpose.msk.msra.mxu1 %vm2044_vm1, %v1865_v21 }
  0x21   : > { %1876 = vmatprep.subr.bf16.mxu1 %v1972_v2 }
  0x27   : > { %1758 = vmatmul.mubr.msk.f32.vlgmr.msra.gmra.mrb[0].mxu1 %vm331_vm0, %v319_v22 }
  0x28   : > { %1799 = vmatprep.mubr.msk.f32.mxu1 %vm1973_vm2, %v1974_v7  ;;  %1879 = vmatpush3.bf16.xpose.msk.msra.mxu1 %vm2154_vm4, %v1877_v44 }
  0x29   : > { %1880 = vmatprep.subr.bf16.mxu1 %v1972_v2 }
  0x30   : > { %1883 = vmatpush3.bf16.xpose.msk.msra.mxu1 %vm2154_vm4, %v1881_v47 }
  0x31   : > { %1823 = vmatprep.subr.mxu1 %v1974_v7 }
  0xeb   : > { %v413_v23 = vpop.f32.mrb[0].mxu0 }
  0xec   : > { %v1740_v24 = vpop.f32.mrb[1].mxu0  ;;  %v414_v27 = vadd.f32 %v1629_v25, %v413_v23 }
  0xee   : > { %v2129_v31 = vmul.f32 0.35355338, %v414_v27 }
  0xfa   : > { %v525_v28 = vpop.f32.mrb[0].mxu1 }
  0xfb   : > { %v2127_v29 = vadd.f32 %v1635_v26, %v525_v28  ;;  %v1759_v30 = vpop.f32.mrb[1].mxu1 }
  0xfd   : > { %622 = vrot.lane.b32.xlu1 %v2127_v29, %s1975_s21  ;;  %1761 = vmatpush3.xpose.msk.msra.mxu0 %vm534_vm3, %v2127_v29 }
  0xfe   : > { %1765 = vmatprep.subr.mxu0 %v1974_v7 }
 0x100   : > { %1763 = vmatmul.mubr.msk.f32.vlgmr.msra.gmra.mrb[2].mxu0 %vm534_vm3, %v2129_v31 }
 0x101   : > { %700 = vrot.lane.b32.xlu1 %v2127_v29, %s1976_s22  ;;  %1767 = vmatprep.mubr.msk.f32.mxu0 %vm1973_vm2, %v1974_v7 }
 0x16f   : > { %v623_v32 = vpop.permute.xlu1 %622 }
 0x170   : > { %1766 = vmatpush3.msra.mxu0 %v623_v32 }
 0x171   : > { %1770 = vmatprep.subr.mxu0 %v1974_v7 }
 0x173   : > { %v701_v51 = vpop.permute.xlu1 %700 }
 0x1d3   : > { %v607_v33 = vpop.f32.mrb[2].mxu0 }
 0x1d4   : > { %v1764_v34 = vpop.f32.mrb[3].mxu0  ;;  %v611_v35 = vsel %vm534_vm3, %v607_v33, -inf }
 0x1d5   : > { %612 = vmax.xlane.f32.xlu0 %v611_v35 }
 0x262   : > { %v613_v36 = vpop.xlane.xlu0 %612 }
 0x263   : > { %v614_v37 = vsub.f32 %v607_v33, %v613_v36 }
 0x265   : > { %v615_v38 = vmul.f32 1.442695, %v614_v37 }
 0x267   : > { %1948 = vpow2.f32 %v615_v38 }
 0x271   : > { %v1949_v39 = vpop.eup %1948 }
 0x272   : > { %v617_v40 = vsel %vm534_vm3, %v1949_v39, 0.0 }
 0x273   : > { %618 = vadd.xlane.f32.xlu0 %v617_v40 }
 0x289   : > { %698 = vrot.lane.b32.xlu0 %v2129_v31, %s1976_s22 }
 0x300   : > { %v619_v48 = vpop.xlane.xlu0 %618 }
 0x301   : > { %1950 = vrcp.f32 %v619_v48 }
 0x304   : > { %v699_v52 = vpop.permute.xlu0 %698 }
 0x30b   : > { %v1951_v49 = vpop.eup %1950 }
 0x30c   : > { %v621_v50 = vmul.f32 %v1951_v49, %v1949_v39 }
 0x30e   : > { %1768 = vmatmul.mubr.msk.f32.vlgmr.msra.gmra.mrb[4].mxu0 %vm534_vm3, %v621_v50 }
 0x30f   : > { %1771 = vmatpush3.xpose.msk.msra.mxu0 %vm534_vm3, %v701_v51  ;;  %1772 = vmatprep.mubr.msk.f32.mxu0 %vm1973_vm2, %v1974_v7 }
 0x310   : > { %1775 = vmatprep.subr.mxu0 %v1974_v7 }
 0x312   : > { %1773 = vmatmul.mubr.msk.f32.vlgmr.msra.gmra.mrb[6].mxu0 %vm534_vm3, %v699_v52 }
 0x313   : > { %1777 = vmatprep.mubr.msk.f32.mxu0 %vm1973_vm2, %v1974_v7 }
 0x3e1   : > { %v694_v53 = vpop.f32.mrb[4].mxu0 }
 0x3e2   : > { %v1769_v54 = vpop.f32.mrb[5].mxu0  ;;  %1800 = vmatmul.mubr.msk.f32.vlgmr.msra.gmra.mrb[2].mxu1 %vm534_vm3, %v694_v53 }
 0x3e3   : > { %1825 = vmatprep.mubr.msk.f32.mxu1 %vm1973_vm2, %v1974_v7 }
 0x3e5   : > { %v772_v55 = vpop.f32.mrb[6].mxu0 }
 0x3e6   : > { %v1774_v56 = vpop.f32.mrb[7].mxu0  ;;  %v776_v57 = vsel %vm534_vm3, %v772_v55, -inf }
 0x3e7   : > { %777 = vmax.xlane.f32.xlu1 %v776_v57 }
 0x3f8   : > { %787 = vrot.lane.b32.xlu1 %v2127_v29, %s1977_s11 }
 0x3fc   : > { %1924 = vrot.lane.b32.xlu1 %v2183_v58, %s1976_s22 }
 0x400   : > { %1039 = vrot.lane.b32.xlu1 %v2127_v29, %s1978_s12 }
 0x404   : > { %1294 = vrot.lane.b32.xlu1 %v2127_v29, %s1979_s13 }
 0x408   : > { %1037 = vrot.lane.b32.xlu1 %v2129_v31, %s1978_s12 }
 0x40c   : > { %1292 = vrot.lane.b32.xlu1 %v2129_v31, %s1979_s13 }
 0x474   : > { %v778_v59 = vpop.xlane.xlu1 %777 }
 0x475   : > { %v779_v60 = vsub.f32 %v772_v55, %v778_v59 }
 0x477   : > { %v780_v61 = vmul.f32 1.442695, %v779_v60 }
 0x478   : > { %v788_v62 = vpop.permute.xlu1 %787 }
 0x479   : > { %1952 = vpow2.f32 %v780_v61  ;;  %1776 = vmatpush3.msra.mxu0 %v788_v62 }
 0x47a   : > { %1868 = vmatprep.subr.bf16.mxu0 %v1972_v2 }
 0x47c   : > { %v1925_v63 = vpop.permute.xlu1 %1924 }
 0x47d   : > { %v1927_v18 = vunpack.i.h.bf16 %v1925_v63  ;;  %v1926_v19 = vunpack.i.l.bf16 %v1925_v63 }
 0x47f   : > { %v1873_v20 = vpack.c.bf16 %v1927_v18, %v1926_v19 }
 0x480   : > { %v1040_v0 = vpop.permute.xlu1 %1039 }
 0x483   : > { %v1953_v1 = vpop.eup %1952 }
 0x484   : > { %v1295_v3 = vpop.permute.xlu1 %1294  ;;  %v782_v4 = vsel %vm534_vm3, %v1953_v1, 0.0 }
 0x485   : > { %783 = vadd.xlane.f32.xlu0 %v782_v4  ;;  %1824 = vmatpush3.xpose.msk.msra.mxu1 %vm534_vm3, %v1295_v3 }
 0x486   : > { %1828 = vmatprep.subr.mxu1 %v1974_v7 }
 0x488   : > { %v1038_v5 = vpop.permute.xlu1 %1037 }
 0x48c   : > { %v1293_v6 = vpop.permute.xlu1 %1292 }
 0x48d   : > { %1826 = vmatmul.mubr.msk.f32.vlgmr.msra.gmra.mrb[4].mxu1 %vm534_vm3, %v1293_v6 }
 0x48e   : > { %1830 = vmatprep.mubr.msk.f32.mxu1 %vm1973_vm2, %v1974_v7 }
 0x49b   : > { %1919 = vrot.lane.b32.xlu0 %v2202_v8, %s1976_s22 }
 0x4b5   : > { %v1033_v9 = vpop.f32.mrb[2].mxu1 }
 0x4b6   : > { %v1801_v10 = vpop.f32.mrb[3].mxu1 }
 0x512   : > { %v784_v11 = vpop.xlane.xlu0 %783 }
 0x513   : > { %1954 = vrcp.f32 %v784_v11 }
 0x516   : > { %v1920_v12 = vpop.permute.xlu0 %1919 }
 0x517   : > { %v1922_v13 = vunpack.i.h.bf16 %v1920_v12  ;;  %v1921_v14 = vunpack.i.l.bf16 %v1920_v12 }
 0x519   : > { %v1869_v16 = vpack.c.bf16 %v1922_v13, %v1921_v14 }
 0x51d   : > { %v1955_v15 = vpop.eup %1954 }
 0x51e   : > { %v786_v17 = vmul.f32 %v1955_v15, %v1953_v1 }
 0x520   : > { %1778 = vmatmul.mubr.msk.f32.vlgmr.msra.gmra.mrb[8].mxu0 %vm534_vm3, %v786_v17 }
 0x521   : > { %1871 = vmatpush3.bf16.xpose.msk.msra.mxu0 %vm2154_vm4, %v1869_v16  ;;  %1788 = vmatprep.mubr.msk.f32.mxu0 %vm1973_vm2, %v1974_v7 }
 0x522   : > { %1872 = vmatprep.subr.bf16.mxu0 %v1972_v2 }
 0x529   : > { %1875 = vmatpush3.bf16.xpose.msk.msra.mxu0 %vm2154_vm4, %v1873_v20 }
 0x52a   : > { %1802 = vmatprep.subr.mxu0 %v1974_v7 }
 0x560   : > { %v1366_v21 = vpop.f32.mrb[4].mxu1 }
 0x561   : > { %v1827_v22 = vpop.f32.mrb[5].mxu1  ;;  %v1370_v23 = vsel %vm534_vm3, %v1366_v21, -inf }
 0x562   : > { %1371 = vmax.xlane.f32.xlu0 %v1370_v23 }
 0x5ef   : > { %v1372_v26 = vpop.xlane.xlu0 %1371 }
 0x5f0   : > { %v1373_v27 = vsub.f32 %v1366_v21, %v1372_v26 }
 0x5f2   : > { %v1374_v28 = vmul.f32 1.442695, %v1373_v27 }
 0x5f3   : > { %v859_v24 = vpop.f32.mrb[8].mxu0 }
 0x5f4   : > { %v1779_v25 = vpop.f32.mrb[9].mxu0  ;;  %1789 = vmatmul.mubr.msk.f32.vlgmr.msra.gmra.mrb[10].mxu0 %vm534_vm3, %v859_v24  ;;  %1956 = vpow2.f32 %v1374_v28 }
 0x5f5   : > { %1803 = vmatpush3.xpose.msk.msra.mxu0 %vm534_vm3, %v1040_v0  ;;  %1804 = vmatprep.mubr.msk.f32.mxu0 %vm1973_vm2, %v1974_v7 }
 0x5f6   : > { %1807 = vmatprep.subr.mxu0 %v1974_v7 }
 0x5f8   : > { %1805 = vmatmul.mubr.msk.f32.vlgmr.msra.gmra.mrb[12].mxu0 %vm534_vm3, %v1038_v5 }
 0x5f9   : > { %1809 = vmatprep.mubr.msk.f32.mxu0 %vm1973_vm2, %v1974_v7 }
 0x5fe   : > { %v1957_v36 = vpop.eup %1956 }
 0x5ff   : > { %v1376_v37 = vsel %vm534_vm3, %v1957_v36, 0.0 }
 0x6c7   : > { %v952_v30 = vpop.f32.mrb[10].mxu0 }
 0x6c8   : > { %v2224_v31 = vadd.f32 %v1033_v9, %v952_v30  ;;  %v1790_v32 = vpop.f32.mrb[11].mxu0 }
 0x6cb   : > { %v1111_v33 = vpop.f32.mrb[12].mxu0 }
 0x6cc   : > { %v1806_v34 = vpop.f32.mrb[13].mxu0  ;;  %v1115_v35 = vsel %vm534_vm3, %v1111_v33, -inf }
 0x6cd   : > { %1116 = vmax.xlane.f32.xlu1 %v1115_v35 }
 0x6d1   : > { %1377 = vadd.xlane.f32.xlu1 %v1376_v37 }
 0x6e2   : > { %1381 = vrot.lane.b32.xlu1 %v2127_v29, %s1980_s14 }
 0x6e6   : > { %1929 = vrot.lane.b32.xlu1 %v2202_v8, %s1978_s12 }
 0x6ea   : > { %1939 = vrot.lane.b32.xlu1 %v2183_v58, %s1978_s12 }
 0x75a   : > { %v1117_v38 = vpop.xlane.xlu1 %1116 }
 0x75b   : > { %v1118_v39 = vsub.f32 %v1111_v33, %v1117_v38 }
 0x75d   : > { %v1119_v40 = vmul.f32 1.442695, %v1118_v39 }
 0x75e   : > { %v1378_v41 = vpop.xlane.xlu1 %1377 }
 0x75f   : > { %1958 = vpow2.f32 %v1119_v40 }
 0x760   : > { %1960 = vrcp.f32 %v1378_v41 }
 0x762   : > { %v1382_v42 = vpop.permute.xlu1 %1381 }
 0x763   : > { %1829 = vmatpush3.msra.mxu1 %v1382_v42 }
 0x764   : > { %1892 = vmatprep.subr.bf16.mxu1 %v1972_v2 }
 0x766   : > { %v1930_v59 = vpop.permute.xlu1 %1929 }
 0x767   : > { %v1932_v60 = vunpack.i.h.bf16 %v1930_v59  ;;  %v1931_v61 = vunpack.i.l.bf16 %v1930_v59 }
 0x769   : > { %v1959_v44 = vpop.eup %1958  ;;  %v1885_v62 = vpack.c.bf16 %v1932_v60, %v1931_v61 }
 0x76a   : > { %v1961_v45 = vpop.eup %1960  ;;  %v1121_v46 = vsel %vm534_vm3, %v1959_v44, 0.0  ;;  %v1940_v63 = vpop.permute.xlu1 %1939 }
 0x76b   : > { %v1380_v47 = vmul.f32 %v1961_v45, %v1957_v36  ;;  %1122 = vadd.xlane.f32.xlu0 %v1121_v46  ;;  %v1942_v0 = vunpack.i.h.bf16 %v1940_v63  ;;  %v1941_v1 = vunpack.i.l.bf16 %v1940_v63 }
 0x76d   : > { %1831 = vmatmul.mubr.msk.f32.vlgmr.msra.gmra.mrb[6].mxu1 %vm534_vm3, %v1380_v47  ;;  %v1889_v3 = vpack.c.bf16 %v1942_v0, %v1941_v1 }
 0x76e   : > { %1841 = vmatprep.mubr.msk.f32.mxu1 %vm1973_vm2, %v1974_v7 }
 0x781   : > { %1126 = vrot.lane.b32.xlu0 %v2127_v29, %s1981_s15 }
 0x785   : > { %1934 = vrot.lane.b32.xlu0 %v2202_v8, %s1979_s13 }
 0x789   : > { %1944 = vrot.lane.b32.xlu0 %v2183_v58, %s1979_s13 }
 0x7f8   : > { %v1123_v48 = vpop.xlane.xlu0 %1122 }
 0x7f9   : > { %1962 = vrcp.f32 %v1123_v48 }
 0x7fc   : > { %v1127_v49 = vpop.permute.xlu0 %1126 }
 0x7fd   : > { %1808 = vmatpush3.msra.mxu0 %v1127_v49 }
 0x7fe   : > { %1884 = vmatprep.subr.bf16.mxu0 %v1972_v2 }
 0x800   : > { %v1935_v50 = vpop.permute.xlu0 %1934 }
 0x801   : > { %v1937_v29 = vunpack.i.h.bf16 %v1935_v50  ;;  %v1936_v51 = vunpack.i.l.bf16 %v1935_v50 }
 0x803   : > { %v1963_v52 = vpop.eup %1962  ;;  %v1893_v53 = vpack.c.bf16 %v1937_v29, %v1936_v51 }
 0x804   : > { %v1125_v54 = vmul.f32 %v1963_v52, %v1959_v44  ;;  %v1945_v55 = vpop.permute.xlu0 %1944 }
 0x805   : > { %1895 = vmatpush3.bf16.xpose.msk.msra.mxu1 %vm2154_vm4, %v1893_v53  ;;  %v1947_v56 = vunpack.i.h.bf16 %v1945_v55  ;;  %v1946_v57 = vunpack.i.l.bf16 %v1945_v55 }
 0x806   : > { %1810 = vmatmul.mubr.msk.f32.vlgmr.msra.gmra.mrb[14].mxu0 %vm534_vm3, %v1125_v54  ;;  %1896 = vmatprep.subr.bf16.mxu1 %v1972_v2 }
 0x807   : > { %1820 = vmatprep.mubr.msk.f32.mxu0 %vm1973_vm2, %v1974_v7  ;;  %v1897_v58 = vpack.c.bf16 %v1947_v56, %v1946_v57  ;;  %1887 = vmatpush3.bf16.xpose.msk.msra.mxu0 %vm2154_vm4, %v1885_v62 }
 0x808   : > { %1888 = vmatprep.subr.bf16.mxu0 %v1972_v2  ;;  %v1677_v2 = vld [vmem:[%s2278_s7] ss:$0 sm:$0xff] }
 0x80d   : > { %1899 = vmatpush3.bf16.xpose.msk.msra.mxu1 %vm2154_vm4, %v1897_v58 }
 0x80f   : > { %1891 = vmatpush3.bf16.xpose.msk.msra.mxu0 %vm2154_vm4, %v1889_v3 }
 0x840   : > { %v1453_v4 = vpop.f32.mrb[6].mxu1 }
 0x841   : > { %v1832_v7 = vpop.f32.mrb[7].mxu1  ;;  %1842 = vmatmul.mubr.msk.f32.vlgmr.msra.gmra.mrb[8].mxu1 %vm534_vm3, %v1453_v4 }
 0x8d9   : > { %v1198_v5 = vpop.f32.mrb[14].mxu0 }
 0x8da   : > { %v1811_v6 = vpop.f32.mrb[15].mxu0  ;;  %1821 = vmatmul.mubr.msk.f32.vlgmr.msra.gmra.mrb[16].mxu0 %vm534_vm3, %v1198_v5 }
 0x914   : > { %v1542_v8 = vpop.f32.mrb[8].mxu1 }
 0x915   : > { %v1843_v9 = vpop.f32.mrb[9].mxu1 }
 0x9ad   : > { %v1287_v10 = vpop.f32.mrb[16].mxu0 }
 0x9ae   : > { %v1291_v11 = vadd.f32 %v1287_v10, %v2224_v31  ;;  %v1822_v12 = vpop.f32.mrb[17].mxu0 }
 0x9b0   : > { %v1546_v13 = vadd.f32 %v1542_v8, %v1291_v11 }
 0x9b2   : > { %v1554_v43 = vadd.f32 %v1677_v2, %v1546_v13 }
 0x9b4   : > { %1555 = vst.msk [vmem:[%s317_s20] sm:$0xff] %vm331_vm0, %v1554_v43 }
 0x9b5 PF: > { %s18_s27 = sadd.s32 1, %s1970_s27  }
 0x9b6   : > { %p15_p4 = scmp.ge.s32.totalorder %s18_s27, 4  }
 0x9b8   :  { %17 = sbr.rel (!%p15_p4) target bundleno = 1 (0x1), region = 85 }

</bundles_post_ra>
